<compile_context>
chip_gen: v7x
topology: tpu7x:2x2x1
jax: 0.10.0
libtpu: 0.0.40
codegen_flags: <defaults>
</compile_context>

<pallas_src>
import jax
import jax.numpy as jnp
import numpy as np
from jax import lax
from jax.experimental import pallas as pl
from jax.experimental.pallas import tpu as pltpu


def cca_kernel(x_ref, w_ref, b_ref, g_ref, o_ref):
    # x_ref block: (1, H, W, C) f32 ; w_ref: (C, 2*Cq+C) bf16 ; b_ref: (1, 2*Cq+C) f32
    # g_ref: (1,) f32 scalar in SMEM ; o_ref block: (1, H, W, C) f32
    x = x_ref[0]                                   # (H, W, C) f32
    H, W, C = x.shape
    Cout = w_ref.shape[1]
    Cq = (Cout - C) // 2

    # ---- fused q|k|v 1x1 projections: one bf16 MXU pass, f32 accumulation ----
    x2 = x.reshape(H * W, C).astype(jnp.bfloat16)
    qkv = jnp.dot(x2, w_ref[...], preferred_element_type=jnp.float32) + b_ref[...]
    q = qkv[:, :Cq].reshape(H, W, Cq)              # (H, W, Cq) f32
    k = qkv[:, Cq:2 * Cq].reshape(H, W, Cq)
    v = qkv[:, 2 * Cq:].reshape(H, W, C)           # (H, W, C)  f32

    # column-major (W-batched) views for the H-direction path
    qT = jnp.transpose(q, (1, 0, 2))               # (W, H, Cq)
    kT = jnp.transpose(k, (1, 0, 2))
    vT = jnp.transpose(v, (1, 0, 2))               # (W, H, C)

    qb, kb, vb = q.astype(jnp.bfloat16), k.astype(jnp.bfloat16), v.astype(jnp.bfloat16)
    qTb, kTb, vTb = qT.astype(jnp.bfloat16), kT.astype(jnp.bfloat16), vT.astype(jnp.bfloat16)

    # ---- criss-cross energies (leading-batch 3D MXU einsums) ----
    # e_H[w, h, h'] = <q[h, w, :], k[h', w, :]>
    eH = jnp.einsum('whc,wgc->whg', qTb, kTb,
                    preferred_element_type=jnp.float32)        # (W, H, H)
    # e_W[h, w, w'] = <q[h, w, :], k[h, w', :]>
    eW = jnp.einsum('hwc,hgc->hwg', qb, kb,
                    preferred_element_type=jnp.float32)        # (H, W, W)

    # INF(): exclude self along the column (h == h'); additive large-negative,
    # built from a single 2D (H, H) mask broadcast over W.
    ih = lax.broadcasted_iota(jnp.int32, (H, H), 0)
    jh = lax.broadcasted_iota(jnp.int32, (H, H), 1)
    neg = jnp.where(ih == jh, jnp.float32(-1e30), jnp.float32(0.0))   # (H, H)
    eH = eH + neg[None, :, :]

    # ---- streamed joint softmax over the (H + W) neighborhood (no concat) ----
    mH = jnp.max(eH, axis=-1, keepdims=True)                   # (W, H, 1)
    mW = jnp.max(eW, axis=-1, keepdims=True)                   # (H, W, 1)
    m = jnp.maximum(jnp.transpose(mH, (1, 0, 2)), mW)          # (H, W, 1)
    pH = jnp.exp(eH - jnp.transpose(m, (1, 0, 2)))             # (W, H, H)
    pW = jnp.exp(eW - m)                                       # (H, W, W)
    s = (jnp.transpose(jnp.sum(pH, axis=-1, keepdims=True), (1, 0, 2))
         + jnp.sum(pW, axis=-1, keepdims=True))                # (H, W, 1)
    inv = pl.reciprocal(s, approx=True)                        # (H, W, 1)
    attH = (pH * jnp.transpose(inv, (1, 0, 2))).astype(jnp.bfloat16)   # (W, H, H)
    attW = (pW * inv).astype(jnp.bfloat16)                             # (H, W, W)

    # ---- attention-weighted value aggregation ----
    # out_H[h, w, c] = sum_h' att_H[h, w, h'] * v[h', w, c]
    outH = jnp.einsum('whg,wgc->whc', attH, vTb,
                      preferred_element_type=jnp.float32)      # (W, H, C)
    outH = jnp.transpose(outH, (1, 0, 2))                      # (H, W, C)
    # out_W[h, w, c] = sum_w' att_W[h, w, w'] * v[h, w', c]
    outW = jnp.einsum('hwg,hgc->hwc', attW, vb,
                      preferred_element_type=jnp.float32)      # (H, W, C)

    gamma = g_ref[0]
    o_ref[0] = (gamma * (outH + outW) + x).astype(o_ref.dtype)


def criss_cross_attention(x_nchw, wq, bq, wk, bk, wv, bv, gamma):
    """x_nchw: (B, C, H, W) float32. Weights: wq/wk (C//8, C), wv (C, C)."""
    B, C, H, W = x_nchw.shape
    Cq = wq.shape[0]
    Cout = 2 * Cq + C

    # NHWC working layout. (If the surrounding model carried NHWC end-to-end,
    # these two full-array HBM transposes could be dropped entirely.)
    x = jnp.transpose(x_nchw, (0, 2, 3, 1)).astype(jnp.float32)

    # Fuse q|k|v conv weights into one (C, 2*Cq+C) matrix (pre-transposed so the
    # kernel does x @ W) in bf16; biases fused into a single f32 row vector.
    w_all_t = jnp.transpose(
        jnp.concatenate([wq, wk, wv], axis=0).astype(jnp.float32), (1, 0)
    ).astype(jnp.bfloat16)                                     # (C, 2*Cq+C)
    b_all = jnp.concatenate([bq, bk, bv], axis=0).reshape(1, Cout).astype(jnp.float32)
    g = gamma.reshape(1).astype(jnp.float32)

    out_nhwc = pl.pallas_call(
        cca_kernel,
        out_shape=jax.ShapeDtypeStruct((B, H, W, C), jnp.float32),
        grid_spec=pltpu.PrefetchScalarGridSpec(
            num_scalar_prefetch=0,
            grid=(B,),
            in_specs=[
                pl.BlockSpec((1, H, W, C), lambda b: (b, 0, 0, 0)),   # x (NHWC)
                pl.BlockSpec((C, Cout), lambda b: (0, 0)),            # fused W (bf16)
                pl.BlockSpec((1, Cout), lambda b: (0, 0)),            # fused bias
                pl.BlockSpec(memory_space=pltpu.MemorySpace.SMEM),    # gamma scalar
            ],
            out_specs=pl.BlockSpec((1, H, W, C), lambda b: (b, 0, 0, 0)),
        ),
        compiler_params=pltpu.CompilerParams(
            # batch elements are independent -> megacore on v7x
            dimension_semantics=("parallel",),
            # explicit VMEM budget: above v5e(16MiB)/v6e(32MiB) defaults, and
            # within v7x's 64 MiB physical VMEM per TensorCore.
            vmem_limit_bytes=32 * 1024 * 1024,
        ),
    )(x, w_all_t, b_all, g)

    return jnp.transpose(out_nhwc, (0, 3, 1, 2))   # back to NCHW


def cca_reference(x, wq, bq, wk, bk, wv, bv, gamma):
    """Pure-JAX mirror of the PyTorch forward (NCHW, f32)."""
    B, C, H, W = x.shape

    def conv1x1(x, w, b):
        return jnp.einsum('bchw,oc->bohw', x, w) + b[None, :, None, None]

    q = conv1x1(x, wq, bq)
    k = conv1x1(x, wk, bk)
    v = conv1x1(x, wv, bv)

    eH = jnp.einsum('bchw,bcgw->bhwg', q, k)               # (B, H, W, H)
    diag = jnp.eye(H, dtype=bool)[None, :, None, :]
    eH = jnp.where(diag, -jnp.inf, eH)
    eW = jnp.einsum('bchw,bchg->bhwg', q, k)               # (B, H, W, W)
    att = jax.nn.softmax(jnp.concatenate([eH, eW], axis=3), axis=3)
    attH, attW = att[:, :, :, :H], att[:, :, :, H:]
    outH = jnp.einsum('bhwg,bcgw->bchw', attH, v)
    outW = jnp.einsum('bhwg,bchg->bchw', attW, v)
    return gamma[0] * (outH + outW) + x


if __name__ == "__main__":
    B, C, H, W = 2, 16, 8, 8
    Cq = C // 8

    key = jax.random.PRNGKey(0)
    ks = jax.random.split(key, 8)
    x = jax.random.normal(ks[0], (B, C, H, W), jnp.float32)

    wq = jax.random.normal(ks[1], (Cq, C), jnp.float32) * 0.1
    bq = jax.random.normal(ks[2], (Cq,), jnp.float32) * 0.1
    wk = jax.random.normal(ks[3], (Cq, C), jnp.float32) * 0.1
    bk = jax.random.normal(ks[4], (Cq,), jnp.float32) * 0.1
    wv = jax.random.normal(ks[5], (C, C), jnp.float32) * 0.1
    bv = jax.random.normal(ks[6], (C,), jnp.float32) * 0.1
    # nn.Parameter(torch.zeros(1)) in __init__; use a nonzero deterministic value
    # here so the attention path actually contributes to the output.
    gamma = jnp.array([0.5], jnp.float32)

    out = criss_cross_attention(x, wq, bq, wk, bk, wv, bv, gamma)
    out = jax.block_until_ready(out)

    ref = jax.block_until_ready(cca_reference(x, wq, bq, wk, bk, wv, bv, gamma))
    # Tolerance reflects bf16 MXU inputs (f32 accumulation) in the kernel vs. an
    # all-f32 reference.
    np.testing.assert_allclose(np.asarray(out), np.asarray(ref),
                               rtol=2e-2, atol=2e-2)

    print("KERNEL_OK")
</pallas_src>

<mosaic_0001>
module attributes {stable_mosaic.version = 11 : i64} {
  func.func @cca_kernel(%arg0: i32, %arg1: memref<1x8x8x16xf32, #tpu.memory_space<vmem>>, %arg2: memref<16x20xbf16, #tpu.memory_space<vmem>>, %arg3: memref<1x20xf32, #tpu.memory_space<vmem>>, %arg4: memref<1xf32, #tpu.memory_space<smem>>, %arg5: memref<1x8x8x16xf32, #tpu.memory_space<vmem>>) attributes {dimension_semantics = [#tpu.dimension_semantics<parallel>], iteration_bounds = array<i64: 2>, scalar_prefetch = 0 : i64, scratch_operands = 0 : i64, tpu.core_type = #tpu.core_type<tc>, window_params = [{transform_indices = @transform_0, window_bounds = array<i64: 1, 8, 8, 16>}, {pipeline_mode = #tpu.pipeline_mode<synchronous>, transform_indices = @transform_1, window_bounds = array<i64: 16, 20>}, {pipeline_mode = #tpu.pipeline_mode<synchronous>, transform_indices = @transform_2, window_bounds = array<i64: 1, 20>}, {transform_indices = @transform_3, window_bounds = array<i64: 1>}, {transform_indices = @transform_4, window_bounds = array<i64: 1, 8, 8, 16>}]} {
    %c0 = arith.constant 0 : index
    %c0_0 = arith.constant 0 : index
    %c0_1 = arith.constant 0 : index
    %c0_2 = arith.constant 0 : index
    %0 = vector.load %arg1[%c0, %c0_0, %c0_1, %c0_2] : memref<1x8x8x16xf32, #tpu.memory_space<vmem>>, vector<1x8x8x16xf32>
    %1 = vector.shape_cast %0 : vector<1x8x8x16xf32> to vector<8x8x16xf32>
    %2 = vector.shape_cast %1 : vector<8x8x16xf32> to vector<64x16xf32>
    %3 = arith.truncf %2 : vector<64x16xf32> to vector<64x16xbf16>
    %c0_3 = arith.constant 0 : index
    %c0_4 = arith.constant 0 : index
    %4 = vector.load %arg2[%c0_3, %c0_4] : memref<16x20xbf16, #tpu.memory_space<vmem>>, vector<16x20xbf16>
    %cst = arith.constant dense<0.000000e+00> : vector<64x20xf32>
    %5 = tpu.matmul %3, %4, %cst {dimension_numbers = #tpu.dot_dimension_numbers<[1], [0], [0], [1], [0, 0, 1, 1], [], []>} : vector<64x16xbf16>, vector<16x20xbf16>, vector<64x20xf32> -> vector<64x20xf32>
    %c0_5 = arith.constant 0 : index
    %c0_6 = arith.constant 0 : index
    %6 = vector.load %arg3[%c0_5, %c0_6] : memref<1x20xf32, #tpu.memory_space<vmem>>, vector<1x20xf32>
    %7 = vector.broadcast %6 : vector<1x20xf32> to vector<64x20xf32>
    %8 = arith.addf %5, %7 : vector<64x20xf32>
    %9 = vector.extract_strided_slice %8 {offsets = [0, 0], sizes = [64, 2], strides = [1, 1]} : vector<64x20xf32> to vector<64x2xf32>
    %10 = vector.shape_cast %9 : vector<64x2xf32> to vector<8x8x2xf32>
    %11 = vector.extract_strided_slice %8 {offsets = [0, 2], sizes = [64, 2], strides = [1, 1]} : vector<64x20xf32> to vector<64x2xf32>
    %12 = vector.shape_cast %11 : vector<64x2xf32> to vector<8x8x2xf32>
    %13 = vector.extract_strided_slice %8 {offsets = [0, 4], sizes = [64, 16], strides = [1, 1]} : vector<64x20xf32> to vector<64x16xf32>
    %14 = vector.shape_cast %13 : vector<64x16xf32> to vector<8x8x16xf32>
    %15 = tpu.transpose %10, [1, 0, 2] : vector<8x8x2xf32> -> vector<8x8x2xf32>
    %16 = tpu.transpose %12, [1, 0, 2] : vector<8x8x2xf32> -> vector<8x8x2xf32>
    %17 = tpu.transpose %14, [1, 0, 2] : vector<8x8x16xf32> -> vector<8x8x16xf32>
    %18 = arith.truncf %10 : vector<8x8x2xf32> to vector<8x8x2xbf16>
    %19 = arith.truncf %12 : vector<8x8x2xf32> to vector<8x8x2xbf16>
    %20 = arith.truncf %14 : vector<8x8x16xf32> to vector<8x8x16xbf16>
    %21 = arith.truncf %15 : vector<8x8x2xf32> to vector<8x8x2xbf16>
    %22 = arith.truncf %16 : vector<8x8x2xf32> to vector<8x8x2xbf16>
    %23 = arith.truncf %17 : vector<8x8x16xf32> to vector<8x8x16xbf16>
    "tpu.trace_start"() <{level = 10 : i32, message = "whc,wgc->whg"}> : () -> ()
    %cst_7 = arith.constant dense<0.000000e+00> : vector<8x8x8xf32>
    %24 = tpu.matmul %21, %22, %cst_7 {dimension_numbers = #tpu.dot_dimension_numbers<[2], [2], [1], [1], [0, 0, 0, 1, 1, 1], [0], [0]>} : vector<8x8x2xbf16>, vector<8x8x2xbf16>, vector<8x8x8xf32> -> vector<8x8x8xf32>
    "tpu.trace_stop"() : () -> ()
    "tpu.trace_start"() <{level = 10 : i32, message = "hwc,hgc->hwg"}> : () -> ()
    %cst_8 = arith.constant dense<0.000000e+00> : vector<8x8x8xf32>
    %25 = tpu.matmul %18, %19, %cst_8 {dimension_numbers = #tpu.dot_dimension_numbers<[2], [2], [1], [1], [0, 0, 0, 1, 1, 1], [0], [0]>} : vector<8x8x2xbf16>, vector<8x8x2xbf16>, vector<8x8x8xf32> -> vector<8x8x8xf32>
    "tpu.trace_stop"() : () -> ()
    %26 = tpu.iota {dimensions = array<i32: 0>} : vector<8x8xi32>
    %27 = tpu.iota {dimensions = array<i32: 1>} : vector<8x8xi32>
    %28 = arith.cmpi eq, %26, %27 : vector<8x8xi32>
    %cst_9 = arith.constant -1.000000e+30 : f32
    %cst_10 = arith.constant 0.000000e+00 : f32
    %29 = vector.broadcast %cst_9 : f32 to vector<8x8xf32>
    %30 = vector.broadcast %cst_10 : f32 to vector<8x8xf32>
    %31 = arith.select %28, %29, %30 : vector<8x8xi1>, vector<8x8xf32>
    %32 = vector.shape_cast %31 : vector<8x8xf32> to vector<1x8x8xf32>
    %33 = vector.broadcast %32 : vector<1x8x8xf32> to vector<8x8x8xf32>
    %34 = arith.addf %24, %33 : vector<8x8x8xf32>
    %cst_11 = arith.constant dense<0xFF800000> : vector<8x8xf32>
    %35 = vector.multi_reduction <maximumf>, %34, %cst_11 [2] : vector<8x8x8xf32> to vector<8x8xf32>
    %36 = vector.shape_cast %35 : vector<8x8xf32> to vector<8x8x1xf32>
    %cst_12 = arith.constant dense<0xFF800000> : vector<8x8xf32>
    %37 = vector.multi_reduction <maximumf>, %25, %cst_12 [2] : vector<8x8x8xf32> to vector<8x8xf32>
    %38 = vector.shape_cast %37 : vector<8x8xf32> to vector<8x8x1xf32>
    %39 = tpu.transpose %36, [1, 0, 2] : vector<8x8x1xf32> -> vector<8x8x1xf32>
    %40 = arith.maximumf %39, %38 : vector<8x8x1xf32>
    %41 = tpu.transpose %40, [1, 0, 2] : vector<8x8x1xf32> -> vector<8x8x1xf32>
    %42 = vector.broadcast %41 : vector<8x8x1xf32> to vector<8x8x8xf32>
    %43 = arith.subf %34, %42 : vector<8x8x8xf32>
    %44 = math.exp %43 : vector<8x8x8xf32>
    %45 = vector.broadcast %40 : vector<8x8x1xf32> to vector<8x8x8xf32>
    %46 = arith.subf %25, %45 : vector<8x8x8xf32>
    %47 = math.exp %46 : vector<8x8x8xf32>
    %cst_13 = arith.constant dense<0.000000e+00> : vector<8x8xf32>
    %48 = vector.multi_reduction <add>, %44, %cst_13 [2] : vector<8x8x8xf32> to vector<8x8xf32>
    %49 = vector.shape_cast %48 : vector<8x8xf32> to vector<8x8x1xf32>
    %50 = tpu.transpose %49, [1, 0, 2] : vector<8x8x1xf32> -> vector<8x8x1xf32>
    %cst_14 = arith.constant dense<0.000000e+00> : vector<8x8xf32>
    %51 = vector.multi_reduction <add>, %47, %cst_14 [2] : vector<8x8x8xf32> to vector<8x8xf32>
    %52 = vector.shape_cast %51 : vector<8x8xf32> to vector<8x8x1xf32>
    %53 = arith.addf %50, %52 : vector<8x8x1xf32>
    %54 = tpu.reciprocal %53 {approx = true} : vector<8x8x1xf32> -> vector<8x8x1xf32>
    %55 = tpu.transpose %54, [1, 0, 2] : vector<8x8x1xf32> -> vector<8x8x1xf32>
    %56 = vector.broadcast %55 : vector<8x8x1xf32> to vector<8x8x8xf32>
    %57 = arith.mulf %44, %56 : vector<8x8x8xf32>
    %58 = arith.truncf %57 : vector<8x8x8xf32> to vector<8x8x8xbf16>
    %59 = vector.broadcast %54 : vector<8x8x1xf32> to vector<8x8x8xf32>
    %60 = arith.mulf %47, %59 : vector<8x8x8xf32>
    %61 = arith.truncf %60 : vector<8x8x8xf32> to vector<8x8x8xbf16>
    "tpu.trace_start"() <{level = 10 : i32, message = "whg,wgc->whc"}> : () -> ()
    %cst_15 = arith.constant dense<0.000000e+00> : vector<8x8x16xf32>
    %62 = tpu.matmul %58, %23, %cst_15 {dimension_numbers = #tpu.dot_dimension_numbers<[2], [1], [1], [2], [0, 0, 0, 1, 1, 2], [0], [0]>} : vector<8x8x8xbf16>, vector<8x8x16xbf16>, vector<8x8x16xf32> -> vector<8x8x16xf32>
    "tpu.trace_stop"() : () -> ()
    %63 = tpu.transpose %62, [1, 0, 2] : vector<8x8x16xf32> -> vector<8x8x16xf32>
    "tpu.trace_start"() <{level = 10 : i32, message = "hwg,hgc->hwc"}> : () -> ()
    %cst_16 = arith.constant dense<0.000000e+00> : vector<8x8x16xf32>
    %64 = tpu.matmul %61, %20, %cst_16 {dimension_numbers = #tpu.dot_dimension_numbers<[2], [1], [1], [2], [0, 0, 0, 1, 1, 2], [0], [0]>} : vector<8x8x8xbf16>, vector<8x8x16xbf16>, vector<8x8x16xf32> -> vector<8x8x16xf32>
    "tpu.trace_stop"() : () -> ()
    %c0_17 = arith.constant 0 : index
    %65 = memref.load %arg4[%c0_17] : memref<1xf32, #tpu.memory_space<smem>>
    %66 = arith.addf %63, %64 : vector<8x8x16xf32>
    %67 = vector.broadcast %65 : f32 to vector<8x8x16xf32>
    %68 = arith.mulf %67, %66 : vector<8x8x16xf32>
    %69 = arith.addf %68, %1 : vector<8x8x16xf32>
    %c0_18 = arith.constant 0 : index
    %c0_19 = arith.constant 0 : index
    %c0_20 = arith.constant 0 : index
    %c0_21 = arith.constant 0 : index
    %70 = vector.load %arg5[%c0_18, %c0_19, %c0_20, %c0_21] : memref<1x8x8x16xf32, #tpu.memory_space<vmem>>, vector<1x8x8x16xf32>
    %71 = vector.shape_cast %70 : vector<1x8x8x16xf32> to vector<8x8x16xf32>
    %72 = vector.shape_cast %69 : vector<8x8x16xf32> to vector<1x8x8x16xf32>
    tpu.vector_store %arg5[%c0_18, %c0_19, %c0_20, %c0_21], %72 {strides = array<i32>} : memref<1x8x8x16xf32, #tpu.memory_space<vmem>>, vector<1x8x8x16xf32>,
    return
  }
  func.func @transform_0(%arg0: i32) -> (i32, i32, i32, i32) {
    %c0_i32 = arith.constant 0 : i32
    %c0_i32_0 = arith.constant 0 : i32
    %c0_i32_1 = arith.constant 0 : i32
    %c0_i32_2 = arith.constant 0 : i32
    return %arg0, %c0_i32, %c0_i32_0, %c0_i32_1 : i32, i32, i32, i32
  }
  func.func @transform_1(%arg0: i32) -> (i32, i32) {
    %c0_i32 = arith.constant 0 : i32
    %c0_i32_0 = arith.constant 0 : i32
    %c0_i32_1 = arith.constant 0 : i32
    return %c0_i32, %c0_i32_0 : i32, i32
  }
  func.func @transform_2(%arg0: i32) -> (i32, i32) {
    %c0_i32 = arith.constant 0 : i32
    %c0_i32_0 = arith.constant 0 : i32
    %c0_i32_1 = arith.constant 0 : i32
    return %c0_i32, %c0_i32_0 : i32, i32
  }
  func.func @transform_3(%arg0: i32) -> i32 {
    %c0_i32 = arith.constant 0 : i32
    %c0_i32_0 = arith.constant 0 : i32
    return %c0_i32 : i32
  }
  func.func @transform_4(%arg0: i32) -> (i32, i32, i32, i32) {
    %c0_i32 = arith.constant 0 : i32
    %c0_i32_0 = arith.constant 0 : i32
    %c0_i32_1 = arith.constant 0 : i32
    %c0_i32_2 = arith.constant 0 : i32
    return %arg0, %c0_i32, %c0_i32_0, %c0_i32_1 : i32, i32, i32, i32
  }
}

</mosaic_0001>

<bundles_post_ra>
// kernel: tpu_custom_call.1
= control target key start
LH: loop header
LB: loop body
LE: loop exit
PB: predicated region body
PF: predicated region fallthrough
CT: control target
= control target key end

     0   :  { %s5110_s0 = inlined_call_operand.hbm [shape: f32[2,8,8,16], index: 0, kind: input, shape index: {}]   ;;  %s5111_s1 = inlined_call_operand.hbm [shape: bf16[16,20], index: 1, kind: input, shape index: {}]   ;;  %s5112_s2 = inlined_call_operand.vmem [shape: f32[1,20], index: 2, kind: input, shape index: {}]   ;;  %s5113_s3 = inlined_call_operand.<no memory space> [shape: f32[1], index: 3, kind: input, shape index: {}]   ;;  %s5114_s4 = inlined_call_operand.hbm [shape: f32[2,8,8,16], index: 4, kind: output, shape index: {}]  }
   0x1   :  { %9 = sst [smem:[#allocation2]] %s5113_s3 }
   0x2   :  { %10 = vsyncpa [#allocation4], 0 }
   0x3   :  { %12 = vsyncpa [#allocation4 + $0x1], 0 }
   0x4   :  { %13 = vsyncpa [#allocation7], 0 }
   0x5   :  { %14 = vsyncpa [#allocation5], 0 }
   0x6   :  { %16 = vsyncpa [#allocation5 + $0x1], 0  ;;  %s4156_s17 = smov 0   ;;  %s4158_s18 = smov 0  }
   0x7   :  { %s4160_s19 = smov 0   ;;  %s4162_s20 = smov 0  }
   0x8 LB: > { %s4177_s3 = sadd.s32 4294967295, %s4110_s20   ;;  %s3526_s21 = sadd.s32 4294967294, %s4110_s20   ;;  %s4110_s20 = sphi %s4162_s20, %s5149_s20   ;;  %s4106_s19 = sphi %s4160_s19, %s5148_s19   ;;  %s4102_s18 = sphi %s4158_s18, %s5147_s18   ;;  %s4098_s17 = sphi %s4156_s17, %s5146_s17  }
   0x9   : > { %p42_p0 = scmp.ne.s32.totalorder %s4102_s18, %s4098_s17  ;;  %p5115_p1 = scmp.eq.s32.totalorder %s4177_s3, 0 }
   0xa   : > { %p135_p3 = scmp.eq.s32.totalorder %s3526_s21, 1  ;;  %p3527_p5 = scmp.ge.s32.totalorder %s4110_s20, 1 }
   0xb   : > { %p4186_p4 = por %p5115_p1, %p42_p0  ;;  %p142_p7 = scmp.lt.s32.totalorder %s4110_s20, 3 }
   0xc   : > { %p4191_p6 = por %p135_p3, %p42_p0  ;;  %s4112_s25 = smov [#allocation6]  }
   0xd   : > { %s5124_s22 = scalar_select %p4186_p4, 1, 0 }
   0xe   : > { %s5125_s23 = scalar_select %p4191_p6, 1, 0 }
   0xf   : > { %p4196_p8 = pnand %p3527_p5, %p142_p7  ;;  %s154_s26 = sshll.u32 %s4112_s25, 4  ;;  %s4200_s26 = int_to_ptr.vmem [resolvable:$true] %s154_s26 }
  0x10   : > { %s4212_s28 = sadd.s32 1, %s4110_s20   ;;  %s29_s29 = sadd.s32 1, %s4106_s19 }
  0x11   : > { %s5126_s24 = scalar_select %p4196_p8, 1, 0 }
  0x12   : > { %p3861_p9 = pneg %p4196_p8  ;;  %s26_s30 = ssub.s32 %s4110_s20, %s4212_s28 }
  0x13   : > { %s3982_s7 = scalar_lea.hbm %s5111_s1, 128 }
  0x14   : > { %p4207_p11 = pnand %p3861_p9, %p5115_p1  ;;  %p3983_p12 = scmp.ne.s32.totalorder %s5111_s1, %s3982_s7 }
  0x15   : > { %p3989_p5 = scmp.lt.u32.totalorder %s3982_s7, %s5111_s1 }
  0x16   : > { %p3984_p13 = pneg %p4207_p11 }
  0x18   : > { %p3985_p0 = pnand %p3984_p13, %p3983_p12 }
  0x1a   : > { %p3986_p3 = pneg %p3985_p0 }
  0x1c   : > { %p3991_p7 = pnand %p3989_p5, %p3986_p3 }
  0x1e   : > { %3994 = shalt.err (!%p3991_p7)
}
  0x1f   : > { %s3995_s12 = scalar_lea.vmem %s4200_s26, 128  ;;  %p4003_p2 = scmp.lt.s32.totalorder %s4200_s26, %s4200_s26 }
  0x20   : > { %p3996_p9 = scmp.ne.s32.totalorder %s4200_s26, %s3995_s12  ;;  %p4004_p6 = scmp.lt.s32.totalorder %s3995_s12, %s3995_s12 }
  0x22   : > { %p3998_p10 = pnand %p3996_p9, %p3984_p13  ;;  %p4005_p4 = por %p4004_p6, %p4003_p2 }
  0x24   : > { %p3999_p1 = pneg %p3998_p10 }
  0x26   : > { %p4006_p8 = pnand %p4005_p4, %p3999_p1 }
  0x28   : > { %4009 = shalt.err (!%p4006_p8)
}
  0x29   : > { %s4113_s13 = smov 64   ;;  %s4114_s14 = smov 4  }
  0x2a   : > { %3864 = dma.hbm_to_vmem [thread:$0]  (!%p4207_p11), %s5111_s1, 128, %s4200_s26, [#allocation7], %s4113_s13, %s4113_s13, %s4114_s14  }
  0x2b   : > { %p27_p2 = scmp.eq.s32.totalorder %s26_s30, 0  ;;  %p36_p1 = scmp.ne.s32.totalorder %s4106_s19, %s4102_s18 }
  0x2c   : > { %p37_p4 = scmp.eq.s32.totalorder %s4110_s20, 0  ;;  %p3874_p6 = scmp.lt.s32.totalorder %s4110_s20, 2 }
  0x2d   : > { %s4243_s21 = scalar_select %p27_p2, %s4106_s19, %s29_s29  }
  0x2e   : > { %p38_p8 = por %p37_p4, %p36_p1  ;;  %p5128_p10 = scmp.eq.s32.totalorder %s4177_s3, 1 }
  0x2f   : > { %s174_s5 = sand.u32 1, %s4106_s19   ;;  %s3580_s6 = sshll.u32 %s4110_s20, 10 }
  0x30   : > { %p4247_p12 = por %p5128_p10, %p36_p1  ;;  %s3530_s7 = sshll.u32 %s174_s5, 6 }
  0x31   : > { %s4256_s9 = scalar_lea.hbm %s5110_s0, %s3580_s6  ;;  %s178_s26 = scalar_lea.vmem [#allocation3], %s3530_s7 }
  0x32   : > { %s185_s29 = sshll.u32 %s178_s26, 4  ;;  %p4258_p11 = pnand %p3874_p6, %p38_p8  ;;  %s4262_s29 = int_to_ptr.vmem [resolvable:$true] %s185_s29 }
  0x33   : > { %s4264_s10 = scalar_lea.sflag [#allocation4], %s174_s5  ;;  %s4010_s11 = scalar_lea.hbm %s4256_s9, 1024 }
  0x34   : > { %p4011_p13 = scmp.ne.s32.totalorder %s4256_s9, %s4010_s11  ;;  %p4012_p0 = pneg %p4258_p11 }
  0x35   : > { %s4015_s14 = scalar_lea.hbm %s5110_s0, 2048  ;;  %p4016_p7 = scmp.lt.u32.totalorder %s4256_s9, %s5110_s0 }
  0x36   : > { %p4013_p3 = pnand %p4012_p0, %p4011_p13  ;;  %p4017_p9 = scmp.lt.u32.totalorder %s4015_s14, %s4010_s11 }
  0x37   : > { %p4019_p1 = scmp.lt.u32.totalorder %s4010_s11, %s4256_s9 }
  0x38   : > { %p4014_p5 = pneg %p4013_p3  ;;  %p4018_p2 = por %p4017_p9, %p4016_p7 }
  0x3a   : > { %p4020_p4 = por %p4019_p1, %p4018_p2 }
  0x3c   : > { %p4021_p6 = pnand %p4020_p4, %p4014_p5 }
  0x3e   : > { %4024 = shalt.err (!%p4021_p6)
}
  0x3f   : > { %s4025_s5 = scalar_lea.vmem %s4262_s29, 1024  ;;  %s4115_s6 = smov [#allocation3]  }
  0x40   : > { %p4026_p8 = scmp.ne.s32.totalorder %s4262_s29, %s4025_s5  ;;  %s4030_s7 = sshll.u32 %s4115_s6, 4  ;;  %s4031_s7 = int_to_ptr.vmem [resolvable:$false] %s4030_s7 }
  0x41   : > { %s4032_s27 = scalar_lea.vmem %s4031_s7, 2048  ;;  %p4033_p3 = scmp.lt.s32.totalorder %s4262_s29, %s4031_s7 }
  0x42   : > { %p4028_p10 = pnand %p4026_p8, %p4012_p0  ;;  %p4034_p7 = scmp.lt.s32.totalorder %s4032_s27, %s4025_s5 }
  0x44   : > { %p4029_p13 = pneg %p4028_p10  ;;  %p4035_p9 = por %p4034_p7, %p4033_p3 }
  0x46   : > { %p4036_p2 = pnand %p4035_p9, %p4029_p13 }
  0x48   : > { %4039 = shalt.err (!%p4036_p2)
}
  0x49   : > { %s4116_s8 = smov 128   ;;  %s4117_s26 = smov 8  }
  0x4a   : > { %3868 = dma.hbm_to_vmem [thread:$0]  (!%p4258_p11), %s4256_s9, 1024, %s4262_s29, %s4264_s10, %s4116_s8, %s4116_s8, %s4117_s26  }
  0x4b   : > { %p5131_p0 = scmp.ne.s32.totalorder %s5126_s24, 0 }
  0x4d   : > { %197 = sbr.rel (%p5131_p0) target bundleno = 1652 (0x674), region = 36 }
  0x54   : > { %s4295_s11 = sand.u32 1, %s4102_s18   ;;  %p5132_p5 = scmp.ne.s32.totalorder %s5124_s22, 0 }
  0x55   : > { %s3534_s12 = sshll.u32 %s4295_s11, 6  ;;  %s200_s13 = scalar_lea.sflag [#allocation4], %s4295_s11 }
  0x56   : > { %s4301_s14 = scalar_lea.vmem [#allocation3], %s3534_s12 }
  0x57   : > { %4085 = dma.done.wait (%p5132_p5), %s200_s13, 1024  }
  0x58   : > { %4087 = vsyncadd (%p5132_p5), %s200_s13, 4294966272  ;;  %p5133_p11 = scmp.eq.s32.totalorder %s4177_s3, 0 }
  0x5a   : > { %4089 = dma.done.wait (%p5133_p11), [#allocation7], 128   ;;  %p5134_p1 = pmov %p5133_p11 }
  0x5b   : > { %v3925_v0 = vld [vmem:[#allocation6] sm:$0xff]   ;;  %v234_v2 = vld [vmem:[%s4301_s14 + $0x8] sm:$0xff]  ;;  %vm260_vm0 = vcmask 130048   ;;  %v235_v3 = vld [vmem:[%s4301_s14 + $0x10] sm:$0xff]  ;;  %v5118_v13 = vmov 0.0   ;;  %vm4119_vm1 = vmmov 0   ;;  %v343_v52 = vlaneseq }
  0x5c   : > { %4091 = vsyncadd (%p5134_p1), [#allocation7], 4294967168  ;;  %v233_v1 = vld [vmem:[%s4301_s14] sm:$0xff]  ;;  %3651 = vmatprep.subr.bf16.mxu0 %v3925_v0  ;;  %v236_v5 = vld [vmem:[%s4301_s14 + $0x18] sm:$0xff]  ;;  %3661 = vmatprep.subr.bf16.mxu1 %v5118_v13  ;;  %s4120_s9 = smov 126   ;;  %vm837_vm2 = vcmask 15360  }
  0x5d   : > { %v241_v4 = vpack.c.bf16 %v234_v2, %v233_v1  ;;  %v237_v6 = vld [vmem:[%s4301_s14 + $0x20] sm:$0xff]  ;;  %v238_v7 = vld [vmem:[%s4301_s14 + $0x28] sm:$0xff]  ;;  %3652 = vmatpush3.bf16.msra.mxu0 %v3925_v0  ;;  %v242_v8 = vpack.c.bf16 %v236_v5, %v235_v3  ;;  %v239_v10 = vld [vmem:[%s4301_s14 + $0x30] sm:$0xff]  ;;  %3663 = vmatprep.mubr.msk.bf16.mxu1 %vm4119_vm1, %v5118_v13  ;;  %v4121_v50 = vmov 1983009808   ;;  %v4423_v56 = vshrl.u32 %v343_v52, 7 }
  0x5e   : > { %v243_v9 = vpack.c.bf16 %v238_v7, %v237_v6  ;;  %v240_v11 = vld [vmem:[%s4301_s14 + $0x38] sm:$0xff]  ;;  %3673 = vmatprep.subr.bf16.mxu0 %v5118_v13  ;;  %v3537_v14 = vld [vmem:[%s5112_s2] ss:$0 sm:$0xff]  ;;  %v341_v51 = vunpack.c.l.s4 %v4121_v50  ;;  %v4122_v63 = vmov 1934713408   ;;  %vm1601_vm3 = vcmask 64512  }
  0x5f   : > { %3653 = vmatprep.mubr.msk.bf16.mxu0 %vm260_vm0, %v241_v4  ;;  %v244_v12 = vpack.c.bf16 %v240_v11, %v239_v10  ;;  %v405_v0 = vunpack.c.l.s4 %v4122_v63  ;;  %s4124_s29 = smov 124   ;;  %vm2509_vm5 = vcmask 1043456   ;;  %s3395_s30 = sld [smem:[#allocation2]] }
  0x60   : > { %3654 = vmatmul.mubr.msk.bf16.vlgmr.msra.gmra.mrb[0].mxu0 %vm260_vm0, %v242_v8  ;;  %v342_v55 = vunpack.c.0.s8 %v341_v51  ;;  %s5029_s10 = scalar_lea.vmem [#allocation8], %s3534_s12  ;;  %s3581_s15 = sshll.u32 %s4177_s3, 10 }
  0x61   : > { %3657 = vmatprep.mubr.msk.bf16.mxu0 %vm260_vm0, %v243_v9  ;;  %v406_v10 = vunpack.c.0.s8 %v405_v0  ;;  %s3443_s16 = sshll.u32 %s5029_s10, 4  ;;  %s5058_s7 = scalar_lea.hbm %s5114_s4, %s3581_s15  ;;  %s5060_s16 = int_to_ptr.vmem [resolvable:$true] %s3443_s16 }
  0x62   : > { %v4436_v62 = vsub.s32 %v342_v55, %v4423_v56  ;;  %s3430_s3 = scalar_lea.sflag [#allocation5], %s4295_s11  ;;  %s4040_s27 = scalar_lea.vmem %s5060_s16, 1024 }
  0x63   : > { %p4041_p4 = scmp.ne.s32.totalorder %s5060_s16, %s4040_s27  ;;  %s4125_s8 = smov [#allocation8]  }
  0x64   : > { %s4044_s26 = sshll.u32 %s4125_s8, 4  ;;  %s4045_s26 = int_to_ptr.vmem [resolvable:$false] %s4044_s26 }
  0x65   : > { %p4042_p6 = pnand %p4041_p4, %p4247_p12  ;;  %s4046_s12 = scalar_lea.vmem %s4045_s26, 2048 }
  0x66   : > { %p4047_p10 = scmp.lt.s32.totalorder %s5060_s16, %s4045_s26  ;;  %p4048_p13 = scmp.lt.s32.totalorder %s4046_s12, %s4040_s27 }
  0x67   : > { %p4043_p8 = pneg %p4042_p6 }
  0x68   : > { %3658 = vmatmul.mubr.msk.bf16.gmra.mrb[4].mxu0 %vm260_vm0, %v244_v12  ;;  %p4049_p3 = por %p4048_p13, %p4047_p10 }
  0x69   : > { %3675 = vmatprep.mubr.msk.bf16.mxu0 %vm4119_vm1, %v5118_v13 }
  0x6a   : > { %p4050_p7 = pnand %p4049_p3, %p4043_p8 }
 0x133   : > { %v3655_v15 = vpop.f32.mrb[0].mxu0 }
 0x134   : > { %v4332_v16 = vadd.f32 %v3655_v15, %v3537_v14  ;;  %v307_v17 = vpop.f32.mrb[1].mxu0 }
 0x135   : > { %v4334_v18 = vadd.f32 %v3537_v14, %v307_v17  ;;  %v3656_v19 = vpop.f32.mrb[2].mxu0 }
 0x136   : > { %v4336_v20 = vadd.f32 %v3656_v19, %v3537_v14  ;;  %v310_v21 = vpop.f32.mrb[3].mxu0  ;;  %v4340_v22 = vpack.c.bf16 %v4332_v16, %v4332_v16 }
 0x137   : > { %v4342_v23 = vadd.f32 %v3537_v14, %v310_v21  ;;  %v4346_v24 = vpack.c.bf16 %v4334_v18, %v4334_v18  ;;  %v338_v15 = vcombine.low %v4334_v18, %v4332_v16 }
 0x138   : > { %934 = vrot.lane.b32.xlu1 %v4340_v22, %s4120_s9  ;;  %v4352_v25 = vpack.c.bf16 %v4336_v20, %v4336_v20 }
 0x139   : > { %835 = vrot.lane.b32.xlu0 %v4346_v24, %s4120_s9  ;;  %v4356_v27 = vpack.c.bf16 %v4342_v23, %v4342_v23  ;;  %v354_v9 = vcombine.low %v4342_v23, %v4336_v20 }
 0x13b   : > { %v3659_v26 = vpop.f32.mrb[4].mxu0 }
 0x13c   : > { %983 = vrot.lane.b32.xlu1 %v4352_v25, %s4120_s9  ;;  %v323_v28 = vpop.f32.mrb[5].mxu0  ;;  %v4382_v36 = vadd.f32 %v3659_v26, %v3537_v14 }
 0x13d   : > { %v3660_v29 = vpop.f32.mrb[6].mxu0  ;;  %885 = vrot.lane.b32.xlu0 %v4356_v27, %s4120_s9  ;;  %v4366_v32 = vadd.f32 %v3537_v14, %v323_v28 }
 0x13e   : > { %v326_v30 = vpop.f32.mrb[7].mxu0  ;;  %v4380_v35 = vadd.f32 %v3660_v29, %v3537_v14  ;;  %v4392_v38 = vpack.c.bf16 %v4382_v36, %v4382_v36  ;;  %v4467_v29 = vrot.slane %v354_v9, %v4436_v62 }
 0x13f   : > { %v4364_v31 = vadd.f32 %v3537_v14, %v326_v30  ;;  %v4376_v34 = vpack.c.bf16 %v4366_v32, %v4366_v32  ;;  %v370_v5 = vcombine.low %v4366_v32, %v4382_v36  ;;  %v4470_v30 = vsub.s32 %v406_v10, %v4423_v56 }
 0x140   : > { %484 = vrot.lane.b32.xlu1 %v4342_v23, %s4120_s9  ;;  %v4388_v37 = vpack.c.bf16 %v4380_v35, %v4380_v35  ;;  %5138 = vst [vmem:[#allocation15_spill] sm:$0xff] %v4392_v38 }
 0x141   : > { %482 = vrot.lane.b32.xlu0 %v4334_v18, %s4120_s9  ;;  %v4371_v33 = vpack.c.bf16 %v4364_v31, %v4364_v31  ;;  %5136 = vst [vmem:[#allocation13_spill] sm:$0xff] %v4376_v34  ;;  %v386_v6 = vcombine.low %v4364_v31, %v4380_v35  ;;  %v4461_v21 = vrot.slane %v370_v5, %v4436_v62 }
 0x142   : > { %5137 = vst [vmem:[#allocation14_spill] sm:$0xff] %v4388_v37  ;;  %v387_v9 = vcombine.high %v4364_v31, %v4380_v35 }
 0x143   : > { %5135 = vst [vmem:[#allocation12_spill] sm:$0xff] %v4371_v33  ;;  %v4464_v26 = vrot.slane %v386_v6, %v4436_v62 }
 0x144   : > { %488 = vrot.lane.b32.xlu1 %v4336_v20, %s4120_s9 }
 0x145   : > { %486 = vrot.lane.b32.xlu0 %v4332_v16, %s4120_s9 }
 0x148   : > { %492 = vrot.lane.b32.xlu1 %v4364_v31, %s4120_s9 }
 0x149   : > { %490 = vrot.lane.b32.xlu0 %v4366_v32, %s4120_s9 }
 0x14c   : > { %1081 = vrot.lane.b32.xlu1 %v4371_v33, %s4120_s9 }
 0x14d   : > { %1032 = vrot.lane.b32.xlu0 %v4376_v34, %s4120_s9 }
 0x150   : > { %496 = vrot.lane.b32.xlu1 %v4380_v35, %s4120_s9 }
 0x151   : > { %494 = vrot.lane.b32.xlu0 %v4382_v36, %s4120_s9 }
 0x154   : > { %1179 = vrot.lane.b32.xlu1 %v4388_v37, %s4120_s9 }
 0x155   : > { %1130 = vrot.lane.b32.xlu0 %v4392_v38, %s4120_s9 }
 0x1aa   : > { %v935_v39 = vpop.permute.xlu1 %934 }
 0x1ab   : > { %v940_v40 = vsel %vm837_vm2, %v935_v39, 0  ;;  %v836_v41 = vpop.permute.xlu0 %835 }
 0x1ac   : > { %3674 = vmatpush3.bf16.xpose.msra.mxu0 %v940_v40  ;;  %v842_v42 = vsel %vm837_vm2, %v836_v41, 0 }
 0x1ad   : > { %3662 = vmatpush3.bf16.xpose.msra.mxu1 %v842_v42  ;;  %3685 = vmatprep.subr.bf16.mxu0 %v5118_v13 }
 0x1ae   : > { %v984_v43 = vpop.permute.xlu1 %983  ;;  %3667 = vmatprep.subr.bf16.mxu1 %v5118_v13 }
 0x1af   : > { %v886_v44 = vpop.permute.xlu0 %885  ;;  %v989_v57 = vsel %vm837_vm2, %v984_v43, 0 }
 0x1b0   : > { %v891_v47 = vsel %vm837_vm2, %v886_v44, 0 }
 0x1b2   : > { %v4400_v45 = vpop.permute.xlu1 %484 }
 0x1b3   : > { %3676 = vmatmul.mubr.msk.bf16.vlgmr.msra.gmra.mrb[8].mxu0 %vm837_vm2, %v4340_v22  ;;  %v4404_v46 = vpop.permute.xlu0 %482 }
 0x1b4   : > { %3664 = vmatmul.mubr.msk.bf16.vlgmr.msra.gmra.mrb[0].mxu1 %vm837_vm2, %v4346_v24  ;;  %3687 = vmatprep.mubr.msk.bf16.mxu0 %vm4119_vm1, %v5118_v13 }
 0x1b5   : > { %3668 = vmatpush3.bf16.xpose.msra.mxu1 %v891_v47  ;;  %3669 = vmatprep.mubr.msk.bf16.mxu1 %vm4119_vm1, %v5118_v13  ;;  %v346_v47 = vrot.slane %v338_v15, %v4436_v62 }
 0x1b6   : > { %v4413_v48 = vpop.permute.xlu1 %488  ;;  %3679 = vmatprep.subr.bf16.mxu1 %v5118_v13 }
 0x1b7   : > { %v4416_v49 = vpop.permute.xlu0 %486  ;;  %v522_v58 = vcombine.low %v4400_v45, %v4413_v48  ;;  %v523_v55 = vcombine.high %v4400_v45, %v4413_v48 }
 0x1b8   : > { %v506_v59 = vcombine.low %v4404_v46, %v4416_v49 }
 0x1b9   : > { %v530_v2 = vrot.slane %v522_v58, %v4436_v62  ;;  %v537_v63 = vrot.slane %v523_v55, %v4436_v62 }
 0x1ba   : > { %v4418_v53 = vpop.permute.xlu1 %492  ;;  %v514_v3 = vrot.slane %v506_v59, %v4436_v62 }
 0x1bb   : > { %v4420_v54 = vpop.permute.xlu0 %490 }
 0x1bc   : > { %3670 = vmatmul.mubr.msk.bf16.vlgmr.msra.gmra.mrb[4].mxu1 %vm837_vm2, %v4356_v27  ;;  %v570_v17 = vcombine.low %v514_v3, %v530_v2 }
 0x1bd   : > { %3680 = vmatpush3.bf16.xpose.msra.mxu1 %v989_v57  ;;  %3681 = vmatprep.mubr.msk.bf16.mxu1 %vm4119_vm1, %v5118_v13  ;;  %v434_v57 = vcombine.low %v4461_v21, %v4464_v26 }
 0x1be   : > { %v1082_v60 = vpop.permute.xlu1 %1081  ;;  %3691 = vmatprep.subr.bf16.mxu1 %v5118_v13  ;;  %v578_v50 = vrot.slane %v570_v17, %v4470_v30 }
 0x1bf   : > { %v1033_v61 = vpop.permute.xlu0 %1032  ;;  %v1087_v11 = vsel %vm837_vm2, %v1082_v60, 0 }
 0x1c0   : > { %v1038_v1 = vsel %vm837_vm2, %v1033_v61, 0  ;;  %v402_v61 = vcombine.low %v346_v47, %v4467_v29 }
 0x1c1   : > { %3686 = vmatpush3.bf16.xpose.msra.mxu0 %v1038_v1 }
 0x1c2   : > { %v497_v4 = vpop.permute.xlu1 %496  ;;  %3697 = vmatprep.subr.bf16.mxu0 %v5118_v13  ;;  %v410_v6 = vrot.slane %v402_v61, %v4470_v30 }
 0x1c3   : > { %v554_v7 = vcombine.low %v4418_v53, %v497_v4  ;;  %v495_v8 = vpop.permute.xlu0 %494  ;;  %v555_v40 = vcombine.high %v4418_v53, %v497_v4  ;;  %v507_v53 = vcombine.high %v4404_v46, %v4416_v49 }
 0x1c4   : > { %v538_v12 = vcombine.low %v4420_v54, %v495_v8  ;;  %3682 = vmatmul.mubr.msk.bf16.vlgmr.msra.gmra.mrb[8].mxu1 %vm837_vm2, %v4352_v25  ;;  %v539_v41 = vcombine.high %v4420_v54, %v495_v8  ;;  %v571_v54 = vcombine.high %v514_v3, %v530_v2  ;;  %v442_v2 = vrot.slane %v434_v57, %v4470_v30 }
 0x1c5   : > { %v562_v14 = vrot.slane %v554_v7, %v4436_v62  ;;  %3692 = vmatpush3.bf16.xpose.msra.mxu1 %v1087_v11  ;;  %3693 = vmatprep.mubr.msk.bf16.mxu1 %vm4119_vm1, %v5118_v13  ;;  %v569_v45 = vrot.slane %v555_v40, %v4436_v62  ;;  %v521_v0 = vrot.slane %v507_v53, %v4436_v62 }
 0x1c6   : > { %v546_v19 = vrot.slane %v538_v12, %v4436_v62  ;;  %3703 = vmatprep.subr.bf16.mxu1 %v5118_v13  ;;  %v1180_v43 = vpop.permute.xlu1 %1179  ;;  %v553_v48 = vrot.slane %v539_v41, %v4436_v62  ;;  %v585_v1 = vrot.slane %v571_v54, %v4470_v30  ;;  %v371_v8 = vcombine.high %v4366_v32, %v4382_v36 }
 0x1c7   : > { %v1131_v28 = vpop.permute.xlu0 %1130  ;;  %v1185_v58 = vsel %vm837_vm2, %v1180_v43, 0  ;;  %v586_v10 = vcombine.low %v521_v0, %v537_v63  ;;  %v466_v11 = vcombine.low %v410_v6, %v442_v2  ;;  %v435_v12 = vcombine.high %v4461_v21, %v4464_v26 }
 0x1c8   : > { %v602_v39 = vcombine.low %v546_v19, %v562_v14  ;;  %3688 = vmatmul.mubr.msk.bf16.vlgmr.msra.gmra.mrb[12].mxu0 %vm837_vm2, %v4376_v34  ;;  %v603_v42 = vcombine.high %v546_v19, %v562_v14  ;;  %v1136_v44 = vsel %vm837_vm2, %v1131_v28, 0  ;;  %v618_v5 = vcombine.low %v553_v48, %v569_v45 }
 0x1c9   : > { %3699 = vmatprep.mubr.msk.bf16.mxu0 %vm4119_vm1, %v5118_v13  ;;  %3698 = vmatpush3.bf16.xpose.msra.mxu0 %v1136_v44  ;;  %v355_v14 = vcombine.high %v4342_v23, %v4336_v20  ;;  %v339_v21 = vcombine.high %v4334_v18, %v4332_v16  ;;  %v385_v26 = vrot.slane %v371_v8, %v4436_v62 }
 0x1ca   : > { %v610_v51 = vrot.slane %v602_v39, %v4470_v30  ;;  %3709 = vmatprep.subr.bf16.mxu0 %v5118_v13  ;;  %v617_v46 = vrot.slane %v603_v42, %v4470_v30  ;;  %v626_v19 = vrot.slane %v618_v5, %v4470_v30  ;;  %v403_v39 = vcombine.high %v346_v47, %v4467_v29 }
 0x1cb   : > { %v467_v40 = vcombine.high %v410_v6, %v442_v2  ;;  %v401_v41 = vrot.slane %v387_v9, %v4436_v62  ;;  %v594_v42 = vrot.slane %v586_v10, %v4470_v30  ;;  %v810_v43 = vpack.c.bf16 %v466_v11, %v466_v11 }
 0x1cc   : > { %3694 = vmatmul.mubr.msk.bf16.vlgmr.msra.gmra.mrb[12].mxu1 %vm837_vm2, %v4371_v33  ;;  %v634_v59 = vcombine.low %v578_v50, %v610_v51  ;;  %v635_v60 = vcombine.high %v578_v50, %v610_v51  ;;  %v636_v7 = vcombine.low %v585_v1, %v617_v46  ;;  %v637_v17 = vcombine.high %v585_v1, %v617_v46 }
 0x1cd   : > { %3704 = vmatpush3.bf16.xpose.msra.mxu1 %v1185_v58  ;;  %3705 = vmatprep.mubr.msk.bf16.mxu1 %vm4119_vm1, %v5118_v13  ;;  %v449_v44 = vrot.slane %v435_v12, %v4470_v30  ;;  %v369_v50 = vrot.slane %v355_v14, %v4436_v62  ;;  %v619_v55 = vcombine.high %v553_v48, %v569_v45 }
 0x1ce   : > { %v818_v49 = vpack.c.bf16 %v634_v59, %v634_v59  ;;  %3715 = vmatprep.subr.bf16.mxu1 %v5118_v13  ;;  %v819_v4 = vpack.c.bf16 %v635_v60, %v635_v60  ;;  %v820_v28 = vpack.c.bf16 %v636_v7, %v636_v7  ;;  %v821_v51 = vpack.c.bf16 %v637_v17, %v637_v17 }
 0x1cf   : > { %v417_v47 = vrot.slane %v403_v39, %v4470_v30  ;;  %v638_v53 = vcombine.low %v594_v42, %v626_v19  ;;  %v811_v54 = vpack.c.bf16 %v467_v40, %v467_v40  ;;  %v353_v57 = vrot.slane %v339_v21, %v4436_v62 }
 0x1d0   : > { %v1237_v3 = vsel %vm837_vm2, %v818_v49, 0  ;;  %3700 = vmatmul.mubr.msk.bf16.vlgmr.msra.gmra.mrb[16].mxu0 %vm837_vm2, %v4392_v38  ;;  %v1283_v15 = vsel %vm837_vm2, %v819_v4, 0  ;;  %v1329_v29 = vsel %vm837_vm2, %v820_v28, 0  ;;  %v587_v58 = vcombine.high %v521_v0, %v537_v63 }
 0x1d1   : > { %3710 = vmatpush3.bf16.xpose.msra.mxu0 %v1237_v3  ;;  %3711 = vmatprep.mubr.msk.bf16.mxu0 %vm4119_vm1, %v5118_v13  ;;  %v468_v59 = vcombine.low %v417_v47, %v449_v44  ;;  %v450_v60 = vcombine.low %v385_v26, %v401_v41  ;;  %v1375_v61 = vsel %vm837_vm2, %v821_v51, 0  ;;  %v639_v45 = vcombine.high %v594_v42, %v626_v19 }
 0x1d2   : > { %3721 = vmatprep.subr.bf16.mxu0 %v5118_v13  ;;  %v633_v48 = vrot.slane %v619_v55, %v4470_v30  ;;  %v822_v46 = vpack.c.bf16 %v638_v53, %v638_v53  ;;  %v418_v49 = vcombine.low %v353_v57, %v369_v50  ;;  %v469_v1 = vcombine.high %v417_v47, %v449_v44 }
 0x1d3   : > { %v601_v63 = vrot.slane %v587_v58, %v4470_v30  ;;  %v812_v0 = vpack.c.bf16 %v468_v59, %v468_v59  ;;  %v458_v2 = vrot.slane %v450_v60, %v4470_v30  ;;  %v823_v3 = vpack.c.bf16 %v639_v45, %v639_v45 }
 0x1d4   : > { %3706 = vmatmul.mubr.msk.bf16.vlgmr.msra.gmra.mrb[16].mxu1 %vm837_vm2, %v4388_v37  ;;  %v1421_v4 = vsel %vm837_vm2, %v822_v46, 0  ;;  %v426_v5 = vrot.slane %v418_v49, %v4470_v30  ;;  %v813_v7 = vpack.c.bf16 %v469_v1, %v469_v1  ;;  %v451_v9 = vcombine.high %v385_v26, %v401_v41 }
 0x1d5   : > { %3716 = vmatpush3.bf16.xpose.msra.mxu1 %v1283_v15  ;;  %3717 = vmatprep.mubr.msk.bf16.mxu1 %vm4119_vm1, %v5118_v13  ;;  %v640_v6 = vcombine.low %v601_v63, %v633_v48  ;;  %v1467_v10 = vsel %vm837_vm2, %v823_v3, 0  ;;  %v641_v11 = vcombine.high %v601_v63, %v633_v48  ;;  %v419_v14 = vcombine.high %v353_v57, %v369_v50 }
 0x1d6   : > { %3727 = vmatprep.subr.bf16.mxu1 %v5118_v13  ;;  %v470_v8 = vcombine.low %v426_v5, %v458_v2  ;;  %v471_v15 = vcombine.high %v426_v5, %v458_v2  ;;  %v465_v19 = vrot.slane %v451_v9, %v4470_v30  ;;  %v1230_v9 = vand.u32 127, %v343_v52 }
 0x1d7   : > { %v824_v12 = vpack.c.bf16 %v640_v6, %v640_v6  ;;  %v825_v28 = vpack.c.bf16 %v641_v11, %v641_v11  ;;  %v433_v21 = vrot.slane %v419_v14, %v4470_v30 }
 0x1d8   : > { %3712 = vmatmul.mubr.msk.bf16.vlgmr.msra.gmra.mrb[20].mxu0 %vm837_vm2, %v810_v43  ;;  %v814_v17 = vpack.c.bf16 %v470_v8, %v470_v8  ;;  %v815_v26 = vpack.c.bf16 %v471_v15, %v471_v15  ;;  %vm1231_vm4 = vcmp.eq.s32.totalorder %v4423_v56, %v1230_v9 }
 0x1d9   : > { %3722 = vmatpush3.bf16.xpose.msra.mxu0 %v1329_v29  ;;  %3723 = vmatprep.mubr.msk.bf16.mxu0 %vm4119_vm1, %v5118_v13  ;;  %v1513_v39 = vsel %vm837_vm2, %v824_v12, 0  ;;  %v472_v40 = vcombine.low %v433_v21, %v465_v19  ;;  %v1559_v41 = vsel %vm837_vm2, %v825_v28, 0  ;;  %v473_v42 = vcombine.high %v433_v21, %v465_v19 }
 0x1da   : > { %3733 = vmatprep.subr.bf16.mxu0 %v5118_v13 }
 0x1db   : > { %v816_v43 = vpack.c.bf16 %v472_v40, %v472_v40  ;;  %v817_v44 = vpack.c.bf16 %v473_v42, %v473_v42 }
 0x1dc   : > { %3718 = vmatmul.mubr.msk.bf16.vlgmr.msra.gmra.mrb[20].mxu1 %vm837_vm2, %v811_v54 }
 0x1dd   : > { %3728 = vmatpush3.bf16.xpose.msra.mxu1 %v1375_v61  ;;  %3729 = vmatprep.mubr.msk.bf16.mxu1 %vm4119_vm1, %v5118_v13 }
 0x1de   : > { %3739 = vmatprep.subr.bf16.mxu1 %v5118_v13 }
 0x1e0   : > { %3724 = vmatmul.mubr.msk.bf16.vlgmr.msra.gmra.mrb[24].mxu0 %vm837_vm2, %v812_v0 }
 0x1e1   : > { %3734 = vmatpush3.bf16.xpose.msra.mxu0 %v1421_v4  ;;  %3735 = vmatprep.mubr.msk.bf16.mxu0 %vm4119_vm1, %v5118_v13 }
 0x1e2   : > { %3745 = vmatprep.subr.bf16.mxu0 %v5118_v13 }
 0x1e4   : > { %3730 = vmatmul.mubr.msk.bf16.vlgmr.msra.gmra.mrb[24].mxu1 %vm837_vm2, %v813_v7 }
 0x1e5   : > { %3740 = vmatpush3.bf16.xpose.msra.mxu1 %v1467_v10  ;;  %3741 = vmatprep.mubr.msk.bf16.mxu1 %vm4119_vm1, %v5118_v13 }
 0x1e6   : > { %3751 = vmatprep.subr.bf16.mxu1 %v5118_v13 }
 0x1e8   : > { %3736 = vmatmul.mubr.msk.bf16.vlgmr.msra.gmra.mrb[28].mxu0 %vm837_vm2, %v814_v17 }
 0x1e9   : > { %3746 = vmatpush3.bf16.xpose.msra.mxu0 %v1513_v39  ;;  %3747 = vmatprep.mubr.msk.bf16.mxu0 %vm4119_vm1, %v5118_v13  ;;  %v1232_v39 = vsel %vm1231_vm4, -1e+30, %v5118_v13 }
 0x1ea   : > { %3757 = vmatprep.subr.bf16.mxu0 %v5118_v13 }
 0x1ec   : > { %3742 = vmatmul.mubr.msk.bf16.vlgmr.msra.gmra.mrb[28].mxu1 %vm837_vm2, %v815_v26 }
 0x1ed   : > { %3752 = vmatpush3.bf16.xpose.msra.mxu1 %v1559_v41  ;;  %3753 = vmatprep.mubr.msk.bf16.mxu1 %vm4119_vm1, %v5118_v13 }
 0x1ee   : > { %3763 = vmatprep.subr.bf16.mxu1 %v5118_v13 }
 0x1f0   : > { %3748 = vmatmul.mubr.msk.bf16.vlgmr.msra.gmra.mrb[32].mxu0 %vm837_vm2, %v816_v43 }
 0x1f1   : > { %3759 = vmatprep.mubr.msk.bf16.mxu0 %vm4119_vm1, %v5118_v13 }
 0x1f4   : > { %3754 = vmatmul.mubr.msk.bf16.vlgmr.msra.gmra.mrb[32].mxu1 %vm837_vm2, %v817_v44 }
 0x1f5   : > { %3765 = vmatprep.mubr.msk.bf16.mxu1 %vm4119_vm1, %v5118_v13 }
 0x286   : > { %v4577_v50 = vpop.f32.mrb[8].mxu0 }
 0x287   : > { %v4579_v51 = vpop.f32.mrb[0].mxu1  ;;  %v3677_v55 = vpop.f32.mrb[9].mxu0 }
 0x288   : > { %v3665_v29 = vpop.f32.mrb[1].mxu1  ;;  %v979_v47 = vpop.f32.mrb[10].mxu0  ;;  %v1626_v53 = vsel %vm1601_vm3, %v4579_v51, -inf }
 0x289   : > { %v3678_v54 = vpop.f32.mrb[11].mxu0  ;;  %1627 = vmax.xlane.f32.xlu1 %v1626_v53  ;;  %v881_v57 = vpop.f32.mrb[2].mxu1 }
 0x28a   : > { %v3666_v58 = vpop.f32.mrb[3].mxu1 }
 0x28f   : > { %v4583_v59 = vpop.f32.mrb[4].mxu1 }
 0x290   : > { %v3671_v60 = vpop.f32.mrb[5].mxu1  ;;  %v1629_v61 = vsel %vm1601_vm3, %v4583_v59, -inf }
 0x291   : > { %1630 = vmax.xlane.f32.xlu0 %v1629_v61  ;;  %v930_v45 = vpop.f32.mrb[6].mxu1 }
 0x292   : > { %v3672_v48 = vpop.f32.mrb[7].mxu1 }
 0x297   : > { %v4587_v46 = vpop.f32.mrb[8].mxu1 }
 0x298   : > { %v3683_v49 = vpop.f32.mrb[9].mxu1 }
 0x299   : > { %v1028_v1 = vpop.f32.mrb[10].mxu1 }
 0x29a   : > { %v3684_v63 = vpop.f32.mrb[11].mxu1 }
 0x29b   : > { %v4589_v0 = vpop.f32.mrb[12].mxu0 }
 0x29c   : > { %v3689_v2 = vpop.f32.mrb[13].mxu0 }
 0x29d   : > { %v1077_v3 = vpop.f32.mrb[14].mxu0 }
 0x29e   : > { %v3690_v4 = vpop.f32.mrb[15].mxu0 }
 0x29f   : > { %v4591_v5 = vpop.f32.mrb[12].mxu1 }
 0x2a0   : > { %v3695_v6 = vpop.f32.mrb[13].mxu1 }
 0x2a1   : > { %v1126_v7 = vpop.f32.mrb[14].mxu1 }
 0x2a2   : > { %v3696_v8 = vpop.f32.mrb[15].mxu1 }
 0x2a3   : > { %v4594_v10 = vpop.f32.mrb[16].mxu0 }
 0x2a4   : > { %v3701_v11 = vpop.f32.mrb[17].mxu0 }
 0x2a5   : > { %v1175_v12 = vpop.f32.mrb[18].mxu0 }
 0x2a6   : > { %v3702_v14 = vpop.f32.mrb[19].mxu0 }
 0x2a7   : > { %v4596_v15 = vpop.f32.mrb[16].mxu1 }
 0x2a8   : > { %v3707_v17 = vpop.f32.mrb[17].mxu1 }
 0x2a9   : > { %v1224_v19 = vpop.f32.mrb[18].mxu1 }
 0x2aa   : > { %v3708_v28 = vpop.f32.mrb[19].mxu1 }
 0x2ab   : > { %v1273_v21 = vpop.f32.mrb[20].mxu0 }
 0x2ac   : > { %v4600_v26 = vadd.f32 %v1273_v21, %v1232_v39  ;;  %v3713_v40 = vpop.f32.mrb[21].mxu0 }
 0x2ad   : > { %v1276_v41 = vpop.f32.mrb[22].mxu0 }
 0x2ae   : > { %v3714_v52 = vpop.f32.mrb[23].mxu0  ;;  %v1602_v43 = vsel %vm1601_vm3, %v4600_v26, -inf }
 0x2af   : > { %v1319_v42 = vpop.f32.mrb[20].mxu1  ;;  %1603 = vmax.xlane.f32.xlu0 %v1602_v43 }
 0x2b0   : > { %v4604_v44 = vadd.f32 %v1319_v42, %v1232_v39  ;;  %v3719_v55 = vpop.f32.mrb[21].mxu1 }
 0x2b1   : > { %v1322_v56 = vpop.f32.mrb[22].mxu1 }
 0x2b2   : > { %v3720_v29 = vpop.f32.mrb[23].mxu1  ;;  %v1605_v47 = vsel %vm1601_vm3, %v4604_v44, -inf }
 0x2b3   : > { %1606 = vmax.xlane.f32.xlu1 %v1605_v47  ;;  %v1365_v53 = vpop.f32.mrb[24].mxu0 }
 0x2b4   : > { %v4608_v54 = vadd.f32 %v1365_v53, %v1232_v39  ;;  %v3725_v57 = vpop.f32.mrb[25].mxu0 }
 0x2b5   : > { %v1368_v58 = vpop.f32.mrb[26].mxu0 }
 0x2b6   : > { %v3726_v60 = vpop.f32.mrb[27].mxu0  ;;  %v1608_v45 = vsel %vm1601_vm3, %v4608_v54, -inf  ;;  %v1632_v58 = vsel %vm1601_vm3, %v4577_v50, -inf }
 0x2b7   : > { %v1411_v61 = vpop.f32.mrb[24].mxu1  ;;  %1609 = vmax.xlane.f32.xlu0 %v1608_v45  ;;  %v1635_v60 = vsel %vm1601_vm3, %v4587_v46, -inf  ;;  %v1644_v45 = vsel %vm1601_vm3, %v4594_v10, -inf }
 0x2b8   : > { %v4612_v48 = vadd.f32 %v1411_v61, %v1232_v39  ;;  %v3731_v49 = vpop.f32.mrb[25].mxu1  ;;  %v1641_v61 = vsel %vm1601_vm3, %v4591_v5, -inf }
 0x2b9   : > { %v1414_v1 = vpop.f32.mrb[26].mxu1  ;;  %v1647_v49 = vsel %vm1601_vm3, %v4596_v15, -inf }
 0x2ba   : > { %v3732_v63 = vpop.f32.mrb[27].mxu1  ;;  %v1611_v2 = vsel %vm1601_vm3, %v4612_v48, -inf  ;;  %v4123_v1 = vmov 0  }
 0x2bb   : > { %1612 = vmax.xlane.f32.xlu0 %v1611_v2  ;;  %v1457_v3 = vpop.f32.mrb[28].mxu0  ;;  %3923 = vset.pattern.permute.xlu1 %v4123_v1 }
 0x2bc   : > { %v4616_v4 = vadd.f32 %v1457_v3, %v1232_v39  ;;  %v3737_v6 = vpop.f32.mrb[29].mxu0  ;;  %3924 = vset.pattern.permute.xlu0 %v4123_v1 }
 0x2bd   : > { %v1460_v7 = vpop.f32.mrb[30].mxu0 }
 0x2be   : > { %v3738_v8 = vpop.f32.mrb[31].mxu0  ;;  %v1614_v11 = vsel %vm1601_vm3, %v4616_v4, -inf }
 0x2bf   : > { %v1503_v9 = vpop.f32.mrb[28].mxu1  ;;  %1615 = vmax.xlane.f32.xlu1 %v1614_v11 }
 0x2c0   : > { %v4620_v12 = vadd.f32 %v1503_v9, %v1232_v39  ;;  %v3743_v14 = vpop.f32.mrb[29].mxu1 }
 0x2c1   : > { %v1506_v17 = vpop.f32.mrb[30].mxu1 }
 0x2c2   : > { %v3744_v19 = vpop.f32.mrb[31].mxu1  ;;  %v1617_v28 = vsel %vm1601_vm3, %v4620_v12, -inf }
 0x2c3   : > { %1618 = vmax.xlane.f32.xlu0 %v1617_v28  ;;  %v1549_v21 = vpop.f32.mrb[32].mxu0 }
 0x2c4   : > { %v4624_v40 = vadd.f32 %v1549_v21, %v1232_v39  ;;  %v3749_v41 = vpop.f32.mrb[33].mxu0 }
 0x2c5   : > { %v1552_v52 = vpop.f32.mrb[34].mxu0 }
 0x2c6   : > { %v3750_v42 = vpop.f32.mrb[35].mxu0  ;;  %v1620_v55 = vsel %vm1601_vm3, %v4624_v40, -inf }
 0x2c7   : > { %v1595_v43 = vpop.f32.mrb[32].mxu1  ;;  %1621 = vmax.xlane.f32.xlu1 %v1620_v55 }
 0x2c8   : > { %v4628_v56 = vadd.f32 %v1595_v43, %v1232_v39  ;;  %v3755_v29 = vpop.f32.mrb[33].mxu1  ;;  %v1638_v39 = vsel %vm1601_vm3, %v4589_v0, -inf }
 0x2c9   : > { %v1598_v47 = vpop.f32.mrb[34].mxu1 }
 0x2ca   : > { %v3756_v53 = vpop.f32.mrb[35].mxu1  ;;  %v1623_v57 = vsel %vm1601_vm3, %v4628_v56, -inf }
 0x2cb   : > { %1624 = vmax.xlane.f32.xlu0 %v1623_v57  ;;  %1633 = vmax.xlane.f32.xlu1 %v1632_v58 }
 0x2cf   : > { %1636 = vmax.xlane.f32.xlu0 %v1635_v60  ;;  %1639 = vmax.xlane.f32.xlu1 %v1638_v39 }
 0x2d3   : > { %1642 = vmax.xlane.f32.xlu0 %v1641_v61  ;;  %1645 = vmax.xlane.f32.xlu1 %v1644_v45 }
 0x2d7   : > { %1648 = vmax.xlane.f32.xlu0 %v1647_v49 }
 0x316   : > { %v1628_v3 = vpop.xlane.xlu1 %1627 }
 0x31e   : > { %v1631_v63 = vpop.xlane.xlu0 %1630 }
 0x33c   : > { %v1604_v2 = vpop.xlane.xlu0 %1603 }
 0x340   : > { %v1607_v7 = vpop.xlane.xlu1 %1606 }
 0x344   : > { %v1610_v6 = vpop.xlane.xlu0 %1609 }
 0x345   : > { %v1650_v17 = vcombine.low %v1604_v2, %v1610_v6  ;;  %v1651_v19 = vcombine.high %v1604_v2, %v1610_v6 }
 0x347   : > { %v1658_v55 = vrot.slane %v1650_v17, %v4436_v62  ;;  %v1665_v29 = vrot.slane %v1651_v19, %v4436_v62 }
 0x348   : > { %v1613_v8 = vpop.xlane.xlu0 %1612 }
 0x349   : > { %v1666_v11 = vcombine.low %v1607_v7, %v1613_v8  ;;  %v1667_v14 = vcombine.high %v1607_v7, %v1613_v8 }
 0x34b   : > { %v1674_v41 = vrot.slane %v1666_v11, %v4436_v62  ;;  %v1681_v52 = vrot.slane %v1667_v14, %v4436_v62 }
 0x34c   : > { %v1616_v9 = vpop.xlane.xlu1 %1615 }
 0x34d   : > { %v1715_v60 = vcombine.high %v1658_v55, %v1674_v41  ;;  %v1730_v39 = vcombine.low %v1665_v29, %v1681_v52  ;;  %v1714_v2 = vcombine.low %v1658_v55, %v1674_v41  ;;  %v1731_v6 = vcombine.high %v1665_v29, %v1681_v52 }
 0x34f   : > { %v1729_v19 = vrot.slane %v1715_v60, %v4470_v30  ;;  %v1722_v41 = vrot.slane %v1714_v2, %v4470_v30  ;;  %v1745_v55 = vrot.slane %v1731_v6, %v4470_v30 }
 0x350   : > { %v1619_v28 = vpop.xlane.xlu0 %1618 }
 0x354   : > { %v1622_v21 = vpop.xlane.xlu1 %1621 }
 0x355   : > { %v1682_v42 = vcombine.low %v1616_v9, %v1622_v21  ;;  %v1683_v43 = vcombine.high %v1616_v9, %v1622_v21 }
 0x357   : > { %v1690_v61 = vrot.slane %v1682_v42, %v4436_v62  ;;  %v1697_v45 = vrot.slane %v1683_v43, %v4436_v62 }
 0x358   : > { %v1625_v47 = vpop.xlane.xlu0 %1624  ;;  %v1634_v58 = vpop.xlane.xlu1 %1633 }
 0x359   : > { %v1698_v53 = vcombine.low %v1619_v28, %v1625_v47  ;;  %v1699_v57 = vcombine.high %v1619_v28, %v1625_v47  ;;  %v1738_v28 = vrot.slane %v1730_v39, %v4470_v30 }
 0x35b   : > { %v1706_v49 = vrot.slane %v1698_v53, %v4436_v62  ;;  %v1713_v1 = vrot.slane %v1699_v57, %v4436_v62 }
 0x35c   : > { %v1637_v7 = vpop.xlane.xlu0 %1636  ;;  %v1640_v17 = vpop.xlane.xlu1 %1639 }
 0x35d   : > { %v1746_v8 = vcombine.low %v1690_v61, %v1706_v49  ;;  %v1747_v9 = vcombine.high %v1690_v61, %v1706_v49  ;;  %v1762_v11 = vcombine.low %v1697_v45, %v1713_v1  ;;  %v1763_v14 = vcombine.high %v1697_v45, %v1713_v1 }
 0x35f   : > { %v1754_v21 = vrot.slane %v1746_v8, %v4470_v30  ;;  %v1761_v42 = vrot.slane %v1747_v9, %v4470_v30  ;;  %v1770_v43 = vrot.slane %v1762_v11, %v4470_v30  ;;  %v1777_v47 = vrot.slane %v1763_v14, %v4470_v30 }
 0x360   : > { %v1643_v52 = vpop.xlane.xlu0 %1642  ;;  %v1646_v9 = vpop.xlane.xlu1 %1645 }
 0x361   : > { %v1780_v29 = vcombine.low %v1729_v19, %v1761_v42  ;;  %v1781_v53 = vcombine.high %v1729_v19, %v1761_v42  ;;  %v1782_v57 = vcombine.low %v1738_v28, %v1770_v43  ;;  %v1783_v61 = vcombine.high %v1738_v28, %v1770_v43 }
 0x362   : > { %v1784_v60 = vcombine.low %v1745_v55, %v1777_v47  ;;  %v1778_v45 = vcombine.low %v1722_v41, %v1754_v21  ;;  %v1779_v39 = vcombine.high %v1722_v41, %v1754_v21  ;;  %v1785_v13 = vcombine.high %v1745_v55, %v1777_v47 }
 0x363   : > { %v1788_v49 = vmax.f32 %v1780_v29, %v1634_v58  ;;  %v1789_v1 = vmax.f32 %v1781_v53, %v1637_v7  ;;  %v1790_v8 = vmax.f32 %v1782_v57, %v1640_v17  ;;  %v1791_v2 = vmax.f32 %v1783_v61, %v1643_v52 }
 0x364   : > { %v1792_v11 = vmax.f32 %v1784_v60, %v1646_v9  ;;  %v1649_v38 = vpop.xlane.xlu0 %1648  ;;  %v1786_v14 = vmax.f32 %v1778_v45, %v1628_v3  ;;  %v1787_v37 = vmax.f32 %v1779_v39, %v1631_v63 }
 0x365   : > { %v1793_v34 = vmax.f32 %v1785_v13, %v1649_v38 }
 0x366   : > { %v1826_v33 = vcombine.low %v1790_v8, %v1792_v11  ;;  %1996 = vperm.xlu1 %3923, %v1786_v14   ;;  %v1794_v6 = vcombine.low %v1786_v14, %v1788_v49  ;;  %v1810_v42 = vcombine.low %v1787_v37, %v1789_v1  ;;  %v1827_v47 = vcombine.high %v1790_v8, %v1792_v11 }
 0x367   : > { %v1842_v19 = vcombine.low %v1791_v2, %v1793_v34  ;;  %v1843_v17 = vcombine.high %v1791_v2, %v1793_v34  ;;  %v1795_v13 = vcombine.high %v1786_v14, %v1788_v49  ;;  %v1811_v38 = vcombine.high %v1787_v37, %v1789_v1 }
 0x368   : > { %v1802_v28 = vrot.slane %v1794_v6, %v4436_v62  ;;  %v1834_v21 = vrot.slane %v1826_v33, %v4436_v62  ;;  %v1818_v7 = vrot.slane %v1810_v42, %v4436_v62  ;;  %v1841_v61 = vrot.slane %v1827_v47, %v4436_v62 }
 0x369   : > { %v1850_v58 = vrot.slane %v1842_v19, %v4436_v62  ;;  %v1857_v29 = vrot.slane %v1843_v17, %v4436_v62  ;;  %v1809_v45 = vrot.slane %v1795_v13, %v4436_v62 }
 0x36a   : > { %2001 = vperm.xlu1 %3923, %v1787_v37   ;;  %v1858_v43 = vcombine.low %v1802_v28, %v1818_v7  ;;  %v1859_v55 = vcombine.high %v1802_v28, %v1818_v7  ;;  %v1825_v37 = vrot.slane %v1811_v38, %v4436_v62 }
 0x36b   : > { %v1890_v3 = vcombine.low %v1834_v21, %v1850_v58  ;;  %v1891_v63 = vcombine.high %v1834_v21, %v1850_v58  ;;  %v1906_v9 = vcombine.low %v1841_v61, %v1857_v29  ;;  %v1907_v21 = vcombine.high %v1841_v61, %v1857_v29 }
 0x36c   : > { %v1866_v41 = vrot.slane %v1858_v43, %v4470_v30  ;;  %v1873_v60 = vrot.slane %v1859_v55, %v4470_v30  ;;  %v1874_v14 = vcombine.low %v1809_v45, %v1825_v37  ;;  %v1875_v58 = vcombine.high %v1809_v45, %v1825_v37 }
 0x36d   : > { %v1898_v52 = vrot.slane %v1890_v3, %v4470_v30  ;;  %v1905_v57 = vrot.slane %v1891_v63, %v4470_v30  ;;  %v1914_v19 = vrot.slane %v1906_v9, %v4470_v30  ;;  %v1921_v17 = vrot.slane %v1907_v21, %v4470_v30 }
 0x36e   : > { %v1882_v42 = vrot.slane %v1874_v14, %v4470_v30 }
 0x36f   : > { %v1923_v33 = vcombine.high %v1866_v41, %v1898_v52  ;;  %v1922_v53 = vcombine.low %v1866_v41, %v1898_v52  ;;  %v1924_v39 = vcombine.low %v1873_v60, %v1905_v57  ;;  %v1925_v6 = vcombine.high %v1873_v60, %v1905_v57 }
 0x370   : > { %v1926_v28 = vcombine.low %v1882_v42, %v1914_v19  ;;  %v1927_v7 = vcombine.high %v1882_v42, %v1914_v19 }
 0x371   : > { %1937 = vperm.xlu0 %3924, %v1923_v33   ;;  %1932 = vperm.xlu1 %3923, %v1922_v53  }
 0x375   : > { %2006 = vperm.xlu0 %3924, %v1788_v49   ;;  %1942 = vperm.xlu1 %3923, %v1924_v39   ;;  %v1889_v49 = vrot.slane %v1875_v58, %v4470_v30 }
 0x377   : > { %v1928_v43 = vcombine.low %v1889_v49, %v1921_v17  ;;  %v1929_v3 = vcombine.high %v1889_v49, %v1921_v17 }
 0x379   : > { %2016 = vperm.xlu0 %3924, %v1790_v8   ;;  %1947 = vperm.xlu1 %3923, %v1925_v6  }
 0x37d   : > { %2026 = vperm.xlu0 %3924, %v1792_v11   ;;  %1952 = vperm.xlu1 %3923, %v1926_v28  }
 0x381   : > { %1957 = vperm.xlu1 %3923, %v1927_v7  }
 0x385   : > { %1962 = vperm.xlu1 %3923, %v1928_v43  }
 0x389   : > { %1967 = vperm.xlu1 %3923, %v1929_v3  }
 0x38d   : > { %2011 = vperm.xlu1 %3923, %v1789_v1  }
 0x391   : > { %2021 = vperm.xlu1 %3923, %v1791_v2  }
 0x395   : > { %2031 = vperm.xlu1 %3923, %v1793_v34  }
 0x3e5   : > { %v1997_v8 = vpop.permute.xlu1 %1996 }
 0x3e6   : > { %v2034_v63 = vsub.f32 %v4579_v51, %v1997_v8 }
 0x3e8   : > { %v2042_v47 = vmul.f32 1.442695, %v2034_v63 }
 0x3e9   : > { %v2002_v11 = vpop.permute.xlu1 %2001 }
 0x3ea   : > { %3926 = vpow2.f32 %v2042_v47  ;;  %v2035_v13 = vsub.f32 %v4583_v59, %v2002_v11 }
 0x3ec   : > { %v2044_v38 = vmul.f32 1.442695, %v2035_v13 }
 0x3ee   : > { %3928 = vpow2.f32 %v2044_v38 }
 0x3f0   : > { %v1938_v41 = vpop.permute.xlu0 %1937  ;;  %v1933_v52 = vpop.permute.xlu1 %1932 }
 0x3f1   : > { %v1971_v55 = vsub.f32 %v4604_v44, %v1938_v41  ;;  %v1970_v29 = vsub.f32 %v4600_v26, %v1933_v52 }
 0x3f3   : > { %v1980_v33 = vmul.f32 1.442695, %v1971_v55  ;;  %v1978_v1 = vmul.f32 1.442695, %v1970_v29 }
 0x3f4   : > { %v4680_v2 = vpop.eup %3926  ;;  %v1943_v34 = vpop.permute.xlu1 %1942 }
 0x3f5   : > { %3930 = vpow2.f32 %v1980_v33  ;;  %v1972_v51 = vsub.f32 %v4608_v54, %v1943_v34  ;;  %v2218_v53 = vsel %vm1601_vm3, %v4680_v2, 0.0  ;;  %v2007_v45 = vpop.permute.xlu0 %2006 }
 0x3f6   : > { %3932 = vpow2.f32 %v1978_v1  ;;  %2219 = vadd.xlane.f32.xlu1 %v2218_v53 }
 0x3f7   : > { %v1982_v59 = vmul.f32 1.442695, %v1972_v51 }
 0x3f8   : > { %v4685_v57 = vpop.eup %3928  ;;  %v1948_v61 = vpop.permute.xlu1 %1947 }
 0x3f9   : > { %v1973_v44 = vsub.f32 %v4612_v48, %v1948_v61  ;;  %v2221_v26 = vsel %vm1601_vm3, %v4685_v57, 0.0  ;;  %3934 = vpow2.f32 %v1982_v59  ;;  %v2017_v28 = vpop.permute.xlu0 %2016 }
 0x3fa   : > { %2222 = vadd.xlane.f32.xlu0 %v2221_v26  ;;  %v2038_v43 = vsub.f32 %v4589_v0, %v2017_v28 }
 0x3fb   : > { %v1984_v60 = vmul.f32 1.442695, %v1973_v44 }
 0x3fc   : > { %v1953_v37 = vpop.permute.xlu1 %1952 }
 0x3fd   : > { %v1974_v54 = vsub.f32 %v4616_v4, %v1953_v37  ;;  %3936 = vpow2.f32 %v1984_v60  ;;  %v2036_v4 = vsub.f32 %v4577_v50, %v2007_v45  ;;  %v2027_v63 = vpop.permute.xlu0 %2026 }
 0x3fe   : > { %v2040_v13 = vsub.f32 %v4594_v10, %v2027_v63 }
 0x3ff   : > { %v4691_v39 = vpop.eup %3930  ;;  %v1986_v9 = vmul.f32 1.442695, %v1974_v54 }
 0x400   : > { %v4693_v14 = vpop.eup %3932  ;;  %v1958_v6 = vpop.permute.xlu1 %1957  ;;  %v2061_v48 = vsel %vm1601_vm3, %v4691_v39, 0.0  ;;  %v2054_v29 = vmul.f32 1.442695, %v2040_v13 }
 0x401   : > { %v1975_v19 = vsub.f32 %v4620_v12, %v1958_v6  ;;  %2062 = vadd.xlane.f32.xlu1 %v2061_v48  ;;  %v2058_v42 = vsel %vm1601_vm3, %v4693_v14, 0.0  ;;  %3938 = vpow2.f32 %v1986_v9  ;;  %v2046_v12 = vmul.f32 1.442695, %v2036_v4 }
 0x402   : > { %2059 = vadd.xlane.f32.xlu0 %v2058_v42 }
 0x403   : > { %v1988_v21 = vmul.f32 1.442695, %v1975_v19  ;;  %v4701_v58 = vpop.eup %3934 }
 0x404   : > { %v1963_v7 = vpop.permute.xlu1 %1962  ;;  %v2064_v49 = vsel %vm1601_vm3, %v4701_v58, 0.0 }
 0x405   : > { %3940 = vpow2.f32 %v1988_v21  ;;  %v1976_v17 = vsub.f32 %v4624_v40, %v1963_v7  ;;  %v2050_v40 = vmul.f32 1.442695, %v2038_v43 }
 0x406   : > { %2065 = vadd.xlane.f32.xlu0 %v2064_v49 }
 0x407   : > { %v1990_v3 = vmul.f32 1.442695, %v1976_v17  ;;  %v4707_v8 = vpop.eup %3936 }
 0x408   : > { %v1968_v47 = vpop.permute.xlu1 %1967  ;;  %v2067_v11 = vsel %vm1601_vm3, %v4707_v8, 0.0 }
 0x409   : > { %3942 = vpow2.f32 %v1990_v3  ;;  %v1977_v50 = vsub.f32 %v4628_v56, %v1968_v47 }
 0x40a   : > { %2068 = vadd.xlane.f32.xlu0 %v2067_v11  ;;  %3944 = vpow2.f32 %v2046_v12 }
 0x40b   : > { %v1992_v38 = vmul.f32 1.442695, %v1977_v50  ;;  %v4713_v41 = vpop.eup %3938 }
 0x40c   : > { %v2012_v0 = vpop.permute.xlu1 %2011  ;;  %v2070_v55 = vsel %vm1601_vm3, %v4713_v41, 0.0 }
 0x40d   : > { %3946 = vpow2.f32 %v1992_v38  ;;  %v2037_v52 = vsub.f32 %v4587_v46, %v2012_v0  ;;  %2071 = vadd.xlane.f32.xlu1 %v2070_v55 }
 0x40e   : > { %3948 = vpow2.f32 %v2050_v40 }
 0x40f   : > { %v4718_v56 = vpop.eup %3940  ;;  %v2048_v33 = vmul.f32 1.442695, %v2037_v52 }
 0x410   : > { %v2022_v1 = vpop.permute.xlu1 %2021  ;;  %v2073_v10 = vsel %vm1601_vm3, %v4718_v56, 0.0 }
 0x411   : > { %3950 = vpow2.f32 %v2048_v33  ;;  %v2039_v34 = vsub.f32 %v4591_v5, %v2022_v1  ;;  %2074 = vadd.xlane.f32.xlu0 %v2073_v10 }
 0x412   : > { %3952 = vpow2.f32 %v2054_v29 }
 0x413   : > { %v4723_v51 = vpop.eup %3942  ;;  %v2052_v46 = vmul.f32 1.442695, %v2039_v34 }
 0x414   : > { %v2032_v53 = vpop.permute.xlu1 %2031  ;;  %v2076_v59 = vsel %vm1601_vm3, %v4723_v51, 0.0  ;;  %v4727_v61 = vpop.eup %3944 }
 0x415   : > { %3954 = vpow2.f32 %v2052_v46  ;;  %v2041_v44 = vsub.f32 %v4596_v15, %v2032_v53  ;;  %2077 = vadd.xlane.f32.xlu1 %v2076_v59  ;;  %v2224_v5 = vsel %vm1601_vm3, %v4727_v61, 0.0 }
 0x417   : > { %v4730_v26 = vpop.eup %3946  ;;  %v2056_v60 = vmul.f32 1.442695, %v2041_v44 }
 0x418   : > { %v2079_v45 = vsel %vm1601_vm3, %v4730_v26, 0.0  ;;  %v4736_v37 = vpop.eup %3948 }
 0x419   : > { %3956 = vpow2.f32 %v2056_v60  ;;  %2225 = vadd.xlane.f32.xlu1 %v2224_v5  ;;  %2080 = vadd.xlane.f32.xlu0 %v2079_v45  ;;  %v2230_v15 = vsel %vm1601_vm3, %v4736_v37, 0.0 }
 0x41b   : > { %v4738_v54 = vpop.eup %3950 }
 0x41c   : > { %v2227_v9 = vsel %vm1601_vm3, %v4738_v54, 0.0  ;;  %v4744_v6 = vpop.eup %3952 }
 0x41d   : > { %2231 = vadd.xlane.f32.xlu1 %v2230_v15  ;;  %2228 = vadd.xlane.f32.xlu0 %v2227_v9  ;;  %v2236_v19 = vsel %vm1601_vm3, %v4744_v6, 0.0 }
 0x41f   : > { %v4746_v48 = vpop.eup %3954 }
 0x420   : > { %v2233_v42 = vsel %vm1601_vm3, %v4746_v48, 0.0 }
 0x421   : > { %2237 = vadd.xlane.f32.xlu1 %v2236_v19  ;;  %2234 = vadd.xlane.f32.xlu0 %v2233_v42 }
 0x423   : > { %v4752_v28 = vpop.eup %3956 }
 0x424   : > { %v2239_v4 = vsel %vm1601_vm3, %v4752_v28, 0.0 }
 0x425   : > { %2240 = vadd.xlane.f32.xlu0 %v2239_v4 }
 0x432   : > { %642 = vrot.lane.b32.xlu1 %v4334_v18, %s4124_s29 }
 0x436   : > { %646 = vrot.lane.b32.xlu1 %v4332_v16, %s4124_s29 }
 0x43a   : > { %648 = vrot.lane.b32.xlu1 %v4336_v20, %s4124_s29 }
 0x43b   : > { %644 = vrot.lane.b32.xlu0 %v4342_v23, %s4124_s29 }
 0x43e   : > { %652 = vrot.lane.b32.xlu1 %v4364_v31, %s4124_s29 }
 0x43f   : > { %650 = vrot.lane.b32.xlu0 %v4366_v32, %s4124_s29 }
 0x442   : > { %656 = vrot.lane.b32.xlu1 %v4380_v35, %s4124_s29 }
 0x443   : > { %654 = vrot.lane.b32.xlu0 %v4382_v36, %s4124_s29 }
 0x483   : > { %v2220_v21 = vpop.xlane.xlu1 %2219 }
 0x487   : > { %v2223_v18 = vpop.xlane.xlu0 %2222 }
 0x48e   : > { %v2063_v20 = vpop.xlane.xlu1 %2062 }
 0x48f   : > { %v2060_v16 = vpop.xlane.xlu0 %2059 }
 0x493   : > { %v2066_v7 = vpop.xlane.xlu0 %2065 }
 0x494   : > { %v2082_v12 = vcombine.low %v2060_v16, %v2066_v7  ;;  %v2083_v63 = vcombine.high %v2060_v16, %v2066_v7 }
 0x496   : > { %v2090_v50 = vrot.slane %v2082_v12, %v4436_v62  ;;  %v2097_v0 = vrot.slane %v2083_v63, %v4436_v62 }
 0x497   : > { %v2069_v17 = vpop.xlane.xlu0 %2068 }
 0x498   : > { %v2098_v23 = vcombine.low %v2063_v20, %v2069_v17  ;;  %v2099_v43 = vcombine.high %v2063_v20, %v2069_v17 }
 0x49a   : > { %v2072_v49 = vpop.xlane.xlu1 %2071  ;;  %v2106_v32 = vrot.slane %v2098_v23, %v4436_v62  ;;  %v2113_v36 = vrot.slane %v2099_v43, %v4436_v62 }
 0x49c   : > { %v2146_v52 = vcombine.low %v2090_v50, %v2106_v32  ;;  %v2147_v55 = vcombine.high %v2090_v50, %v2106_v32  ;;  %v2162_v34 = vcombine.low %v2097_v0, %v2113_v36  ;;  %v2163_v46 = vcombine.high %v2097_v0, %v2113_v36 }
 0x49e   : > { %v2075_v31 = vpop.xlane.xlu0 %2074  ;;  %v2154_v15 = vrot.slane %v2146_v52, %v4470_v30  ;;  %v2161_v9 = vrot.slane %v2147_v55, %v4470_v30  ;;  %v2170_v7 = vrot.slane %v2162_v34, %v4470_v30  ;;  %v2177_v17 = vrot.slane %v2163_v46, %v4470_v30 }
 0x4a2   : > { %v2078_v3 = vpop.xlane.xlu1 %2077 }
 0x4a3   : > { %v2114_v47 = vcombine.low %v2072_v49, %v2078_v3  ;;  %v2115_v35 = vcombine.high %v2072_v49, %v2078_v3 }
 0x4a5   : > { %v2122_v29 = vrot.slane %v2114_v47, %v4436_v62  ;;  %v2129_v33 = vrot.slane %v2115_v35, %v4436_v62 }
 0x4a6   : > { %v2081_v11 = vpop.xlane.xlu0 %2080  ;;  %v2226_v40 = vpop.xlane.xlu1 %2225 }
 0x4a7   : > { %v2130_v13 = vcombine.low %v2075_v31, %v2081_v11  ;;  %v2131_v38 = vcombine.high %v2075_v31, %v2081_v11 }
 0x4a9   : > { %v2138_v1 = vrot.slane %v2130_v13, %v4436_v62  ;;  %v2145_v10 = vrot.slane %v2131_v38, %v4436_v62 }
 0x4aa   : > { %v2229_v53 = vpop.xlane.xlu0 %2228  ;;  %v2232_v59 = vpop.xlane.xlu1 %2231 }
 0x4ab   : > { %v2178_v44 = vcombine.low %v2122_v29, %v2138_v1  ;;  %v2179_v60 = vcombine.high %v2122_v29, %v2138_v1  ;;  %v2194_v5 = vcombine.low %v2129_v33, %v2145_v10  ;;  %v2195_v45 = vcombine.high %v2129_v33, %v2145_v10 }
 0x4ad   : > { %v2186_v19 = vrot.slane %v2178_v44, %v4470_v30  ;;  %v2193_v42 = vrot.slane %v2179_v60, %v4470_v30  ;;  %v2202_v4 = vrot.slane %v2194_v5, %v4470_v30  ;;  %v2209_v16 = vrot.slane %v2195_v45, %v4470_v30 }
 0x4ae   : > { %v2235_v20 = vpop.xlane.xlu0 %2234  ;;  %v2238_v49 = vpop.xlane.xlu1 %2237 }
 0x4af   : > { %v2210_v23 = vcombine.low %v2154_v15, %v2186_v19  ;;  %v2211_v12 = vcombine.high %v2154_v15, %v2186_v19  ;;  %v2212_v43 = vcombine.low %v2161_v9, %v2193_v42  ;;  %v2213_v31 = vcombine.high %v2161_v9, %v2193_v42 }
 0x4b0   : > { %v2214_v3 = vcombine.low %v2170_v7, %v2202_v4  ;;  %v2215_v63 = vcombine.high %v2170_v7, %v2202_v4  ;;  %v2216_v50 = vcombine.low %v2177_v17, %v2209_v16  ;;  %v2217_v52 = vcombine.high %v2177_v17, %v2209_v16 }
 0x4b1   : > { %v2242_v32 = vadd.f32 %v2220_v21, %v2210_v23  ;;  %v2243_v47 = vadd.f32 %v2223_v18, %v2211_v12  ;;  %v2244_v35 = vadd.f32 %v2226_v40, %v2212_v43  ;;  %v2245_v36 = vadd.f32 %v2229_v53, %v2213_v31 }
 0x4b2   : > { %v2241_v11 = vpop.xlane.xlu0 %2240  ;;  %v643_v13 = vpop.permute.xlu1 %642  ;;  %v2246_v38 = vadd.f32 %v2232_v59, %v2214_v3  ;;  %v2247_v0 = vadd.f32 %v2235_v20, %v2215_v63  ;;  %v2248_v55 = vadd.f32 %v2238_v49, %v2216_v50 }
 0x4b3   : > { %3958 = vrcp.f32 %v2242_v32  ;;  %v2249_v29 = vadd.f32 %v2241_v11, %v2217_v52 }
 0x4b4   : > { %3960 = vrcp.f32 %v2243_v47 }
 0x4b5   : > { %3962 = vrcp.f32 %v2244_v35 }
 0x4b6   : > { %3964 = vrcp.f32 %v2245_v36  ;;  %v645_v33 = vpop.permute.xlu0 %644  ;;  %v647_v1 = vpop.permute.xlu1 %646 }
 0x4b7   : > { %3966 = vrcp.f32 %v2246_v38  ;;  %v667_v10 = vcombine.high %v643_v13, %v647_v1  ;;  %v666_v18 = vcombine.low %v643_v13, %v647_v1 }
 0x4b8   : > { %3968 = vrcp.f32 %v2247_v0 }
 0x4b9   : > { %3970 = vrcp.f32 %v2248_v55  ;;  %v674_v59 = vrot.slane %v666_v18, %v4436_v62  ;;  %v4792_v44 = vrot.slane %v667_v10, %v4436_v62 }
 0x4ba   : > { %3972 = vrcp.f32 %v2249_v29  ;;  %v651_v21 = vpop.permute.xlu0 %650  ;;  %v649_v40 = vpop.permute.xlu1 %648 }
 0x4bb   : > { %v682_v34 = vcombine.low %v645_v33, %v649_v40  ;;  %v683_v46 = vcombine.high %v645_v33, %v649_v40 }
 0x4bd   : > { %v4788_v53 = vpop.eup %3958  ;;  %v690_v60 = vrot.slane %v682_v34, %v4436_v62  ;;  %v4796_v5 = vrot.slane %v683_v46, %v4436_v62 }
 0x4be   : > { %v4798_v45 = vpop.eup %3960  ;;  %v655_v15 = vpop.permute.xlu0 %654 }
 0x4bf   : > { %v653_v9 = vpop.permute.xlu1 %652  ;;  %v4800_v19 = vpop.eup %3962  ;;  %v731_v42 = vcombine.high %v674_v59, %v690_v60  ;;  %v746_v4 = vcombine.low %v4792_v44, %v4796_v5  ;;  %v747_v16 = vcombine.high %v4792_v44, %v4796_v5  ;;  %v698_v20 = vcombine.low %v651_v21, %v655_v15 }
 0x4c0   : > { %v4806_v7 = vpop.eup %3964  ;;  %v2258_v17 = vcombine.low %v4788_v53, %v4800_v19  ;;  %v699_v23 = vcombine.high %v651_v21, %v655_v15  ;;  %v730_v43 = vcombine.low %v674_v59, %v690_v60  ;;  %v2259_v35 = vcombine.high %v4788_v53, %v4800_v19 }
 0x4c1   : > { %v4810_v49 = vpop.eup %3966  ;;  %v2274_v3 = vcombine.low %v4798_v45, %v4806_v7  ;;  %v706_v36 = vrot.slane %v698_v20, %v4436_v62  ;;  %v2275_v1 = vcombine.high %v4798_v45, %v4806_v7 }
 0x4c2   : > { %v4812_v12 = vpop.eup %3968  ;;  %v2266_v11 = vrot.slane %v2258_v17, %v4436_v62  ;;  %v713_v0 = vrot.slane %v699_v23, %v4436_v62  ;;  %v738_v33 = vrot.slane %v730_v43, %v4470_v30  ;;  %v2273_v23 = vrot.slane %v2259_v35, %v4436_v62 }
 0x4c3   : > { %v657_v31 = vpop.permute.xlu1 %656  ;;  %v4816_v63 = vpop.eup %3970  ;;  %v2282_v13 = vrot.slane %v2274_v3, %v4436_v62  ;;  %v2289_v3 = vrot.slane %v2275_v1, %v4436_v62  ;;  %v754_v35 = vrot.slane %v746_v4, %v4470_v30 }
 0x4c4   : > { %v714_v32 = vcombine.low %v653_v9, %v657_v31  ;;  %v715_v47 = vcombine.high %v653_v9, %v657_v31  ;;  %v4820_v50 = vpop.eup %3972  ;;  %v2290_v38 = vcombine.low %v4810_v49, %v4816_v63  ;;  %v2291_v10 = vcombine.high %v4810_v49, %v4816_v63 }
 0x4c5   : > { %v2306_v29 = vcombine.low %v4812_v12, %v4820_v50  ;;  %v2322_v60 = vcombine.low %v2266_v11, %v2282_v13  ;;  %v2307_v15 = vcombine.high %v4812_v12, %v4820_v50  ;;  %v745_v9 = vrot.slane %v731_v42, %v4470_v30 }
 0x4c6   : > { %v722_v52 = vrot.slane %v714_v32, %v4436_v62  ;;  %v729_v55 = vrot.slane %v715_v47, %v4436_v62  ;;  %v2298_v46 = vrot.slane %v2290_v38, %v4436_v62  ;;  %v2323_v47 = vcombine.high %v2266_v11, %v2282_v13 }
 0x4c7   : > { %v2314_v59 = vrot.slane %v2306_v29, %v4436_v62  ;;  %v2321_v32 = vrot.slane %v2307_v15, %v4436_v62  ;;  %v2330_v42 = vrot.slane %v2322_v60, %v4470_v30  ;;  %v2305_v29 = vrot.slane %v2291_v10, %v4436_v62 }
 0x4c8   : > { %v762_v18 = vcombine.low %v706_v36, %v722_v52  ;;  %v763_v21 = vcombine.high %v706_v36, %v722_v52  ;;  %v778_v40 = vcombine.low %v713_v0, %v729_v55  ;;  %v779_v34 = vcombine.high %v713_v0, %v729_v55 }
 0x4c9   : > { %v2354_v43 = vcombine.low %v2298_v46, %v2314_v59  ;;  %v2355_v31 = vcombine.high %v2298_v46, %v2314_v59  ;;  %v2370_v13 = vcombine.low %v2305_v29, %v2321_v32  ;;  %v2337_v59 = vrot.slane %v2323_v47, %v4470_v30 }
 0x4ca   : > { %v770_v20 = vrot.slane %v762_v18, %v4470_v30  ;;  %v777_v17 = vrot.slane %v763_v21, %v4470_v30  ;;  %v786_v52 = vrot.slane %v778_v40, %v4470_v30  ;;  %v2338_v10 = vcombine.low %v2273_v23, %v2289_v3 }
 0x4cb   : > { %v2362_v55 = vrot.slane %v2354_v43, %v4470_v30  ;;  %v2369_v11 = vrot.slane %v2355_v31, %v4470_v30  ;;  %v2378_v47 = vrot.slane %v2370_v13, %v4470_v30  ;;  %v2339_v5 = vcombine.high %v2273_v23, %v2289_v3 }
 0x4cc   : > { %v794_v36 = vcombine.low %v738_v33, %v770_v20  ;;  %v795_v38 = vcombine.high %v738_v33, %v770_v20  ;;  %v4847_v0 = vcombine.low %v745_v9, %v777_v17  ;;  %v793_v33 = vrot.slane %v779_v34, %v4470_v30 }
 0x4cd   : > { %v2387_v1 = vcombine.high %v2330_v42, %v2362_v55  ;;  %v2386_v46 = vcombine.low %v2330_v42, %v2362_v55  ;;  %v797_v15 = vcombine.high %v745_v9, %v777_v17  ;;  %v4859_v4 = vcombine.low %v754_v35, %v786_v52 }
 0x4ce   : > { %v826_v18 = vpack.c.bf16 %v794_v36, %v794_v36  ;;  %v827_v21 = vpack.c.bf16 %v795_v38, %v795_v38  ;;  %v761_v20 = vrot.slane %v747_v16, %v4470_v30  ;;  %v2371_v34 = vcombine.high %v2305_v29, %v2321_v32 }
 0x4cf   : > { %2401 = vperm.xlu1 %3923, %v2387_v1   ;;  %2396 = vperm.xlu0 %3924, %v2386_v46   ;;  %v2389_v43 = vcombine.high %v2337_v59, %v2369_v11  ;;  %v2388_v31 = vcombine.low %v2337_v59, %v2369_v11  ;;  %v5139_v36 = vmov 0.0   ;;  %v4868_v38 = vcombine.high %v754_v35, %v786_v52 }
 0x4d0   : > { %v2511_v40 = vsel %vm2509_vm5, %v826_v18, 0  ;;  %v2557_v60 = vsel %vm2509_vm5, %v827_v21, 0  ;;  %v4870_v9 = vcombine.low %v761_v20, %v793_v33  ;;  %v4872_v17 = vcombine.high %v761_v20, %v793_v33 }
 0x4d1   : > { %3758 = vmatpush3.bf16.msra.mxu0 %v2511_v40  ;;  %3764 = vmatpush3.bf16.msra.mxu1 %v2557_v60  ;;  %v2346_v44 = vrot.slane %v2338_v10, %v4470_v30  ;;  %v2385_v42 = vrot.slane %v2371_v34, %v4470_v30  ;;  %v2353_v55 = vrot.slane %v2339_v5, %v4470_v30 }
 0x4d2   : > { %3769 = vmatprep.subr.bf16.mxu0 %v5139_v36  ;;  %3775 = vmatprep.subr.bf16.mxu1 %v5139_v36  ;;  %v830_v1 = vpack.c.bf16 %v4859_v4, %v4859_v4  ;;  %v832_v4 = vpack.c.bf16 %v4870_v9, %v4870_v9 }
 0x4d3   : > { %2411 = vperm.xlu1 %3923, %v2389_v43   ;;  %2406 = vperm.xlu0 %3924, %v2388_v31   ;;  %v2391_v16 = vcombine.high %v2346_v44, %v2378_v47  ;;  %v2390_v32 = vcombine.low %v2346_v44, %v2378_v47  ;;  %v2393_v29 = vcombine.high %v2353_v55, %v2385_v42 }
 0x4d4   : > { %v2392_v52 = vcombine.low %v2353_v55, %v2385_v42  ;;  %v2695_v33 = vsel %vm2509_vm5, %v830_v1, 0  ;;  %v2787_v31 = vsel %vm2509_vm5, %v832_v4, 0 }
 0x4d7   : > { %2421 = vperm.xlu1 %3923, %v2391_v16   ;;  %2416 = vperm.xlu0 %3924, %v2390_v32  }
 0x4db   : > { %2431 = vperm.xlu1 %3923, %v2393_v29   ;;  %2426 = vperm.xlu0 %3924, %v2392_v52  }
 0x4df   : > { %2457 = vperm.xlu1 %3923, %v4798_v45   ;;  %2452 = vperm.xlu0 %3924, %v4788_v53   ;;  %v5140_v53 = vld [vmem:[#allocation12_spill] sm:$0xff] }
 0x4e3   : > { %3059 = vrot.lane.b32.xlu1 %v4356_v27, %s4124_s29  ;;  %3011 = vrot.lane.b32.xlu0 %v4346_v24, %s4124_s29  ;;  %v5141_v27 = vld [vmem:[#allocation13_spill] sm:$0xff]  ;;  %v5142_v24 = vld [vmem:[#allocation14_spill] sm:$0xff] }
 0x4e7   : > { %2467 = vperm.xlu1 %3923, %v4806_v7   ;;  %2462 = vperm.xlu0 %3924, %v4800_v19  }
 0x4eb   : > { %3155 = vrot.lane.b32.xlu1 %v4352_v25, %s4124_s29  ;;  %3107 = vrot.lane.b32.xlu0 %v4340_v22, %s4124_s29  ;;  %v5143_v25 = vld [vmem:[#allocation15_spill] sm:$0xff] }
 0x4ef   : > { %2477 = vperm.xlu1 %3923, %v4812_v12   ;;  %2472 = vperm.xlu0 %3924, %v4810_v49   ;;  %v828_v49 = vpack.c.bf16 %v4847_v0, %v4847_v0  ;;  %v829_v12 = vpack.c.bf16 %v797_v15, %v797_v15 }
 0x4f1   : > { %v2603_v35 = vsel %vm2509_vm5, %v828_v49, 0  ;;  %v2649_v18 = vsel %vm2509_vm5, %v829_v12, 0 }
 0x4f3   : > { %3251 = vrot.lane.b32.xlu1 %v5140_v53, %s4124_s29  ;;  %3203 = vrot.lane.b32.xlu0 %v5141_v27, %s4124_s29 }
 0x4f7   : > { %2487 = vperm.xlu1 %3923, %v4820_v50   ;;  %2482 = vperm.xlu0 %3924, %v4816_v63  }
 0x4fb   : > { %3347 = vrot.lane.b32.xlu1 %v5142_v24, %s4124_s29  ;;  %3299 = vrot.lane.b32.xlu0 %v5143_v25, %s4124_s29 }
 0x54e   : > { %v2397_v22 = vpop.permute.xlu0 %2396  ;;  %v2402_v45 = vpop.permute.xlu1 %2401 }
 0x54f   : > { %v2434_v19 = vmul.f32 %v4693_v14, %v2397_v22  ;;  %v2435_v7 = vmul.f32 %v4691_v39, %v2402_v45 }
 0x551   : > { %v2442_v23 = vpack.c.bf16 %v2434_v19, %v2434_v19  ;;  %v2443_v50 = vpack.c.bf16 %v2435_v7, %v2435_v7 }
 0x552   : > { %v2407_v3 = vpop.permute.xlu0 %2406  ;;  %v2412_v63 = vpop.permute.xlu1 %2411 }
 0x553   : > { %3760 = vmatmul.mubr.msk.bf16.vlgmr.msra.gmra.mrb[36].mxu0 %vm1601_vm3, %v2442_v23  ;;  %3766 = vmatmul.mubr.msk.bf16.vlgmr.msra.gmra.mrb[36].mxu1 %vm1601_vm3, %v2443_v50  ;;  %v2436_v39 = vmul.f32 %v4701_v58, %v2407_v3  ;;  %v2437_v14 = vmul.f32 %v4707_v8, %v2412_v63  ;;  %v831_v58 = vpack.c.bf16 %v4868_v38, %v4868_v38 }
 0x554   : > { %3770 = vmatpush3.bf16.msra.mxu0 %v2603_v35  ;;  %3776 = vmatpush3.bf16.msra.mxu1 %v2649_v18 }
 0x555   : > { %3771 = vmatprep.mubr.msk.bf16.mxu0 %vm4119_vm1, %v5139_v36  ;;  %3777 = vmatprep.mubr.msk.bf16.mxu1 %vm4119_vm1, %v5139_v36  ;;  %v2444_v46 = vpack.c.bf16 %v2436_v39, %v2436_v39  ;;  %v2445_v8 = vpack.c.bf16 %v2437_v14, %v2437_v14  ;;  %v2741_v59 = vsel %vm2509_vm5, %v831_v58, 0 }
 0x556   : > { %v2417_v0 = vpop.permute.xlu0 %2416  ;;  %v2422_v21 = vpop.permute.xlu1 %2421  ;;  %3781 = vmatprep.subr.bf16.mxu0 %v5139_v36  ;;  %3787 = vmatprep.subr.bf16.mxu1 %v5139_v36 }
 0x557   : > { %v2438_v40 = vmul.f32 %v4713_v41, %v2417_v0  ;;  %v2439_v60 = vmul.f32 %v4718_v56, %v2422_v21  ;;  %v833_v41 = vpack.c.bf16 %v4872_v17, %v4872_v17 }
 0x559   : > { %v2446_v20 = vpack.c.bf16 %v2438_v40, %v2438_v40  ;;  %v2447_v56 = vpack.c.bf16 %v2439_v60, %v2439_v60  ;;  %v2833_v47 = vsel %vm2509_vm5, %v833_v41, 0 }
 0x55a   : > { %v2427_v11 = vpop.permute.xlu0 %2426  ;;  %v2432_v13 = vpop.permute.xlu1 %2431 }
 0x55b   : > { %3772 = vmatmul.mubr.msk.bf16.vlgmr.msra.gmra.mrb[40].mxu0 %vm1601_vm3, %v2444_v46  ;;  %3778 = vmatmul.mubr.msk.bf16.vlgmr.msra.gmra.mrb[40].mxu1 %vm1601_vm3, %v2445_v8  ;;  %v2440_v38 = vmul.f32 %v4723_v51, %v2427_v11  ;;  %v2441_v9 = vmul.f32 %v4730_v26, %v2432_v13 }
 0x55c   : > { %3782 = vmatpush3.bf16.msra.mxu0 %v2695_v33  ;;  %3788 = vmatpush3.bf16.msra.mxu1 %v2741_v59 }
 0x55d   : > { %3783 = vmatprep.mubr.msk.bf16.mxu0 %vm4119_vm1, %v5139_v36  ;;  %3789 = vmatprep.mubr.msk.bf16.mxu1 %vm4119_vm1, %v5139_v36  ;;  %v2448_v5 = vpack.c.bf16 %v2440_v38, %v2440_v38  ;;  %v2449_v16 = vpack.c.bf16 %v2441_v9, %v2441_v9 }
 0x55e   : > { %v2453_v10 = vpop.permute.xlu0 %2452  ;;  %v2458_v15 = vpop.permute.xlu1 %2457  ;;  %3793 = vmatprep.subr.bf16.mxu0 %v5139_v36  ;;  %3799 = vmatprep.subr.bf16.mxu1 %v5139_v36 }
 0x55f   : > { %v2490_v55 = vmul.f32 %v4680_v2, %v2453_v10  ;;  %v2491_v29 = vmul.f32 %v4685_v57, %v2458_v15 }
 0x561   : > { %v2498_v27 = vpack.c.bf16 %v2490_v55, %v2490_v55  ;;  %v2499_v24 = vpack.c.bf16 %v2491_v29, %v2491_v29 }
 0x562   : > { %v3012_v34 = vpop.permute.xlu0 %3011  ;;  %v3060_v43 = vpop.permute.xlu1 %3059 }
 0x563   : > { %3784 = vmatmul.mubr.msk.bf16.vlgmr.msra.gmra.mrb[44].mxu0 %vm1601_vm3, %v2446_v20  ;;  %3790 = vmatmul.mubr.msk.bf16.vlgmr.msra.gmra.mrb[44].mxu1 %vm1601_vm3, %v2447_v56  ;;  %v3017_v51 = vsel %vm2509_vm5, %v3012_v34, 0  ;;  %v3065_v26 = vsel %vm2509_vm5, %v3060_v43, 0 }
 0x564   : > { %3794 = vmatpush3.bf16.msra.mxu0 %v2787_v31  ;;  %3800 = vmatpush3.bf16.msra.mxu1 %v2833_v47 }
 0x565   : > { %3795 = vmatprep.mubr.msk.bf16.mxu0 %vm4119_vm1, %v5139_v36  ;;  %3801 = vmatprep.mubr.msk.bf16.mxu1 %vm4119_vm1, %v5139_v36 }
 0x566   : > { %v2463_v17 = vpop.permute.xlu0 %2462  ;;  %v2468_v44 = vpop.permute.xlu1 %2467  ;;  %3805 = vmatprep.subr.bf16.mxu0 %v5139_v36  ;;  %3811 = vmatprep.subr.bf16.mxu1 %v5139_v36 }
 0x567   : > { %v2492_v45 = vmul.f32 %v4727_v61, %v2463_v17  ;;  %v2493_v19 = vmul.f32 %v4738_v54, %v2468_v44 }
 0x569   : > { %v2500_v7 = vpack.c.bf16 %v2492_v45, %v2492_v45  ;;  %v2501_v49 = vpack.c.bf16 %v2493_v19, %v2493_v19 }
 0x56a   : > { %v3108_v32 = vpop.permute.xlu0 %3107  ;;  %v3156_v42 = vpop.permute.xlu1 %3155 }
 0x56b   : > { %3796 = vmatmul.mubr.msk.bf16.vlgmr.msra.gmra.mrb[48].mxu0 %vm1601_vm3, %v2448_v5  ;;  %3802 = vmatmul.mubr.msk.bf16.vlgmr.msra.gmra.mrb[48].mxu1 %vm1601_vm3, %v2449_v16  ;;  %v3113_v25 = vsel %vm2509_vm5, %v3108_v32, 0  ;;  %v3161_v2 = vsel %vm2509_vm5, %v3156_v42, 0 }
 0x56c   : > { %3806 = vmatpush3.bf16.msra.mxu0 %v3017_v51  ;;  %3812 = vmatpush3.bf16.msra.mxu1 %v3065_v26 }
 0x56d   : > { %3807 = vmatprep.mubr.msk.bf16.mxu0 %vm4119_vm1, %v5139_v36  ;;  %3813 = vmatprep.mubr.msk.bf16.mxu1 %vm4119_vm1, %v5139_v36 }
 0x56e   : > { %v2473_v52 = vpop.permute.xlu0 %2472  ;;  %v2478_v53 = vpop.permute.xlu1 %2477  ;;  %3817 = vmatprep.subr.bf16.mxu0 %v5139_v36  ;;  %3823 = vmatprep.subr.bf16.mxu1 %v5139_v36 }
 0x56f   : > { %v2494_v54 = vmul.f32 %v4736_v37, %v2473_v52  ;;  %v2495_v3 = vmul.f32 %v4746_v48, %v2478_v53 }
 0x571   : > { %v2502_v18 = vpack.c.bf16 %v2494_v54, %v2494_v54  ;;  %v2503_v39 = vpack.c.bf16 %v2495_v3, %v2495_v3 }
 0x572   : > { %v3204_v57 = vpop.permute.xlu0 %3203  ;;  %v3252_v22 = vpop.permute.xlu1 %3251 }
 0x573   : > { %3808 = vmatmul.mubr.msk.bf16.vlgmr.msra.gmra.mrb[52].mxu0 %vm1601_vm3, %v2498_v27  ;;  %3814 = vmatmul.mubr.msk.bf16.vlgmr.msra.gmra.mrb[52].mxu1 %vm1601_vm3, %v2499_v24  ;;  %v3209_v50 = vsel %vm2509_vm5, %v3204_v57, 0  ;;  %v3257_v61 = vsel %vm2509_vm5, %v3252_v22, 0 }
 0x574   : > { %3818 = vmatpush3.bf16.msra.mxu0 %v3113_v25  ;;  %3824 = vmatpush3.bf16.msra.mxu1 %v3161_v2 }
 0x575   : > { %3819 = vmatprep.mubr.msk.bf16.mxu0 %vm4119_vm1, %v5139_v36  ;;  %3825 = vmatprep.mubr.msk.bf16.mxu1 %vm4119_vm1, %v5139_v36 }
 0x576   : > { %3829 = vmatprep.subr.bf16.mxu0 %v5139_v36  ;;  %3835 = vmatprep.subr.bf16.mxu1 %v5139_v36  ;;  %v2483_v12 = vpop.permute.xlu0 %2482  ;;  %v2488_v23 = vpop.permute.xlu1 %2487 }
 0x577   : > { %v2496_v48 = vmul.f32 %v4744_v6, %v2483_v12  ;;  %v2497_v0 = vmul.f32 %v4752_v28, %v2488_v23 }
 0x579   : > { %v2504_v21 = vpack.c.bf16 %v2496_v48, %v2496_v48  ;;  %v2505_v1 = vpack.c.bf16 %v2497_v0, %v2497_v0 }
 0x57a   : > { %v3300_v63 = vpop.permute.xlu0 %3299  ;;  %v3348_v35 = vpop.permute.xlu1 %3347 }
 0x57b   : > { %3820 = vmatmul.mubr.msk.bf16.vlgmr.msra.gmra.mrb[56].mxu0 %vm1601_vm3, %v2500_v7  ;;  %3826 = vmatmul.mubr.msk.bf16.vlgmr.msra.gmra.mrb[56].mxu1 %vm1601_vm3, %v2501_v49  ;;  %v3305_v14 = vsel %vm2509_vm5, %v3300_v63, 0  ;;  %v3353_v37 = vsel %vm2509_vm5, %v3348_v35, 0 }
 0x57c   : > { %3830 = vmatpush3.bf16.msra.mxu0 %v3209_v50  ;;  %3836 = vmatpush3.bf16.msra.mxu1 %v3257_v61 }
 0x57d   : > { %3831 = vmatprep.mubr.msk.bf16.mxu0 %vm4119_vm1, %v5139_v36  ;;  %3837 = vmatprep.mubr.msk.bf16.mxu1 %vm4119_vm1, %v5139_v36 }
 0x57e   : > { %3841 = vmatprep.subr.bf16.mxu0 %v5139_v36  ;;  %3847 = vmatprep.subr.bf16.mxu1 %v5139_v36 }
 0x583   : > { %3832 = vmatmul.mubr.msk.bf16.vlgmr.msra.gmra.mrb[60].mxu0 %vm1601_vm3, %v2502_v18  ;;  %3838 = vmatmul.mubr.msk.bf16.vlgmr.msra.gmra.mrb[60].mxu1 %vm1601_vm3, %v2503_v39 }
 0x584   : > { %3842 = vmatpush3.bf16.msra.mxu0 %v3305_v14  ;;  %3848 = vmatpush3.bf16.msra.mxu1 %v3353_v37 }
 0x585   : > { %3843 = vmatprep.mubr.msk.bf16.mxu0 %vm4119_vm1, %v5139_v36  ;;  %3849 = vmatprep.mubr.msk.bf16.mxu1 %vm4119_vm1, %v5139_v36 }
 0x58b   : > { %3844 = vmatmul.mubr.msk.bf16.vlgmr.msra.gmra.mrb[64].mxu0 %vm1601_vm3, %v2504_v21  ;;  %3850 = vmatmul.mubr.msk.bf16.vlgmr.msra.gmra.mrb[64].mxu1 %vm1601_vm3, %v2505_v1 }
 0x626   : > { %v2547_v58 = vpop.f32.mrb[36].mxu0  ;;  %v2593_v46 = vpop.f32.mrb[36].mxu1 }
 0x627   : > { %v3761_v8 = vpop.f32.mrb[37].mxu0  ;;  %v3767_v11 = vpop.f32.mrb[37].mxu1 }
 0x628   : > { %v2550_v13 = vpop.f32.mrb[38].mxu0  ;;  %v2596_v6 = vpop.f32.mrb[38].mxu1 }
 0x629   : > { %v3762_v33 = vpop.f32.mrb[39].mxu0  ;;  %v3768_v28 = vpop.f32.mrb[39].mxu1 }
 0x62e   : > { %v2639_v59 = vpop.f32.mrb[40].mxu0  ;;  %v2685_v40 = vpop.f32.mrb[40].mxu1 }
 0x62f   : > { %v2875_v60 = vcombine.low %v2547_v58, %v2639_v59  ;;  %v2876_v10 = vcombine.high %v2547_v58, %v2639_v59  ;;  %v2891_v15 = vcombine.low %v2593_v46, %v2685_v40  ;;  %v2892_v36 = vcombine.high %v2593_v46, %v2685_v40  ;;  %v3773_v4 = vpop.f32.mrb[41].mxu0  ;;  %v3779_v41 = vpop.f32.mrb[41].mxu1 }
 0x630   : > { %v2642_v20 = vpop.f32.mrb[42].mxu0  ;;  %v2688_v56 = vpop.f32.mrb[42].mxu1  ;;  %v5013_v58 = vstv %s3395_s30 }
 0x631   : > { %v2883_v34 = vrot.slane %v2875_v60, %v4436_v62  ;;  %v2890_v43 = vrot.slane %v2876_v10, %v4436_v62  ;;  %v2899_v31 = vrot.slane %v2891_v15, %v4436_v62  ;;  %v2906_v47 = vrot.slane %v2892_v36, %v4436_v62  ;;  %v3774_v38 = vpop.f32.mrb[43].mxu0  ;;  %v3780_v9 = vpop.f32.mrb[43].mxu1 }
 0x632   : > { %v3975_v9 = vld [vmem:[%s4301_s14 + $0x8] sm:$0xff] }
 0x633   : > { %v2939_v17 = vcombine.low %v2883_v34, %v2899_v31  ;;  %v2940_v44 = vcombine.high %v2883_v34, %v2899_v31  ;;  %v2955_v5 = vcombine.low %v2890_v43, %v2906_v47  ;;  %v2956_v16 = vcombine.high %v2890_v43, %v2906_v47  ;;  %v3974_v47 = vld [vmem:[%s4301_s14] sm:$0xff] }
 0x635   : > { %v2947_v14 = vrot.slane %v2939_v17, %v4470_v30  ;;  %v2954_v37 = vrot.slane %v2940_v44, %v4470_v30  ;;  %v2963_v8 = vrot.slane %v2955_v5, %v4470_v30  ;;  %v5017_v11 = vrot.slane %v2956_v16, %v4470_v30 }
 0x636   : > { %v2731_v32 = vpop.f32.mrb[44].mxu0  ;;  %v2777_v42 = vpop.f32.mrb[44].mxu1 }
 0x637   : > { %v3785_v51 = vpop.f32.mrb[45].mxu0  ;;  %v3791_v26 = vpop.f32.mrb[45].mxu1 }
 0x638   : > { %v2734_v55 = vpop.f32.mrb[46].mxu0  ;;  %v2780_v29 = vpop.f32.mrb[46].mxu1 }
 0x639   : > { %v3786_v52 = vpop.f32.mrb[47].mxu0  ;;  %v3792_v53 = vpop.f32.mrb[47].mxu1 }
 0x63e   : > { %v2823_v27 = vpop.f32.mrb[48].mxu0  ;;  %v2869_v24 = vpop.f32.mrb[48].mxu1 }
 0x63f   : > { %v2907_v25 = vcombine.low %v2731_v32, %v2823_v27  ;;  %v2908_v2 = vcombine.high %v2731_v32, %v2823_v27  ;;  %v2923_v57 = vcombine.low %v2777_v42, %v2869_v24  ;;  %v2924_v22 = vcombine.high %v2777_v42, %v2869_v24  ;;  %v3797_v45 = vpop.f32.mrb[49].mxu0  ;;  %v3803_v19 = vpop.f32.mrb[49].mxu1  ;;  %v3976_v24 = vld [vmem:[%s4301_s14 + $0x10] sm:$0xff] }
 0x640   : > { %v2826_v7 = vpop.f32.mrb[50].mxu0  ;;  %v2872_v49 = vpop.f32.mrb[50].mxu1 }
 0x641   : > { %v2915_v12 = vrot.slane %v2907_v25, %v4436_v62  ;;  %v2922_v23 = vrot.slane %v2908_v2, %v4436_v62  ;;  %v2931_v50 = vrot.slane %v2923_v57, %v4436_v62  ;;  %v2938_v61 = vrot.slane %v2924_v22, %v4436_v62  ;;  %v3798_v54 = vpop.f32.mrb[51].mxu0  ;;  %v3804_v3 = vpop.f32.mrb[51].mxu1  ;;  %v3977_v2 = vld [vmem:[%s4301_s14 + $0x18] sm:$0xff] }
 0x643   : > { %v2971_v63 = vcombine.low %v2915_v12, %v2931_v50  ;;  %v2972_v35 = vcombine.high %v2915_v12, %v2931_v50  ;;  %v2987_v18 = vcombine.low %v2922_v23, %v2938_v61  ;;  %v2988_v39 = vcombine.high %v2922_v23, %v2938_v61 }
 0x645   : > { %v2979_v48 = vrot.slane %v2971_v63, %v4470_v30  ;;  %v2986_v0 = vrot.slane %v2972_v35, %v4470_v30  ;;  %v2995_v21 = vrot.slane %v2987_v18, %v4470_v30  ;;  %v5011_v1 = vrot.slane %v2988_v39, %v4470_v30  ;;  %v3978_v35 = vld [vmem:[%s4301_s14 + $0x20] sm:$0xff]  ;;  %v3979_v39 = vld [vmem:[%s4301_s14 + $0x28] sm:$0xff] }
 0x646   : > { %v3053_v62 = vpop.f32.mrb[52].mxu0  ;;  %v3101_v46 = vpop.f32.mrb[52].mxu1 }
 0x647   : > { %v3003_v13 = vcombine.low %v2947_v14, %v2979_v48  ;;  %v3004_v6 = vcombine.high %v2947_v14, %v2979_v48  ;;  %v3809_v33 = vpop.f32.mrb[53].mxu0  ;;  %v3815_v28 = vpop.f32.mrb[53].mxu1  ;;  %v3005_v59 = vcombine.low %v2954_v37, %v2986_v0  ;;  %v3006_v40 = vcombine.high %v2954_v37, %v2986_v0 }
 0x648   : > { %v3056_v60 = vpop.f32.mrb[54].mxu0  ;;  %v3104_v10 = vpop.f32.mrb[54].mxu1  ;;  %v3007_v15 = vcombine.low %v2963_v8, %v2995_v21  ;;  %v3008_v36 = vcombine.high %v2963_v8, %v2995_v21  ;;  %v3009_v4 = vcombine.low %v5017_v11, %v5011_v1  ;;  %v3010_v30 = vcombine.high %v5017_v11, %v5011_v1  ;;  %v3980_v28 = vld [vmem:[%s4301_s14 + $0x30] sm:$0xff] }
 0x649   : > { %v3396_v41 = vadd.f32 %v3053_v62, %v3003_v13  ;;  %v3397_v20 = vadd.f32 %v3101_v46, %v3004_v6  ;;  %v3810_v56 = vpop.f32.mrb[55].mxu0  ;;  %v3816_v34 = vpop.f32.mrb[55].mxu1 }
 0x64b   : > { %v3405_v43 = vmul.f32 %v5013_v58, %v3396_v41  ;;  %v3406_v31 = vmul.f32 %v5013_v58, %v3397_v20 }
 0x64d   : > { %v3413_v38 = vadd.f32 %v3974_v47, %v3405_v43  ;;  %v3414_v17 = vadd.f32 %v3975_v9, %v3406_v31 }
 0x64e   : > { %v3149_v44 = vpop.f32.mrb[56].mxu0  ;;  %v3197_v5 = vpop.f32.mrb[56].mxu1 }
 0x64f   : > { %3421 = vst.msk [vmem:[%s5029_s10] sm:$0xff] %vm260_vm0, %v3413_v38  ;;  %3422 = vst.msk [vmem:[%s5029_s10 + $0x8] sm:$0xff] %vm260_vm0, %v3414_v17  ;;  %v3398_v16 = vadd.f32 %v3149_v44, %v3005_v59  ;;  %v3399_v32 = vadd.f32 %v3197_v5, %v3006_v40  ;;  %v3821_v42 = vpop.f32.mrb[57].mxu0  ;;  %v3827_v51 = vpop.f32.mrb[57].mxu1  ;;  %v3981_v40 = vld [vmem:[%s4301_s14 + $0x38] sm:$0xff] }
 0x650   : > { %v3152_v26 = vpop.f32.mrb[58].mxu0  ;;  %v3200_v55 = vpop.f32.mrb[58].mxu1 }
 0x651   : > { %v3407_v29 = vmul.f32 %v5013_v58, %v3398_v16  ;;  %v3408_v52 = vmul.f32 %v5013_v58, %v3399_v32  ;;  %v3822_v53 = vpop.f32.mrb[59].mxu0  ;;  %v3828_v27 = vpop.f32.mrb[59].mxu1 }
 0x653   : > { %v3415_v25 = vadd.f32 %v3976_v24, %v3407_v29  ;;  %v3416_v57 = vadd.f32 %v3977_v2, %v3408_v52 }
 0x655   : > { %3423 = vst.msk [vmem:[%s5029_s10 + $0x10] sm:$0xff] %vm260_vm0, %v3415_v25  ;;  %3424 = vst.msk [vmem:[%s5029_s10 + $0x18] sm:$0xff] %vm260_vm0, %v3416_v57 }
 0x656   : > { %v3245_v22 = vpop.f32.mrb[60].mxu0  ;;  %v3293_v45 = vpop.f32.mrb[60].mxu1 }
 0x657   : > { %v3400_v19 = vadd.f32 %v3245_v22, %v3007_v15  ;;  %v3401_v7 = vadd.f32 %v3293_v45, %v3008_v36  ;;  %v3833_v49 = vpop.f32.mrb[61].mxu0  ;;  %v3839_v12 = vpop.f32.mrb[61].mxu1 }
 0x658   : > { %v3248_v23 = vpop.f32.mrb[62].mxu0  ;;  %v3296_v50 = vpop.f32.mrb[62].mxu1 }
 0x659   : > { %v3409_v61 = vmul.f32 %v5013_v58, %v3400_v19  ;;  %v3410_v54 = vmul.f32 %v5013_v58, %v3401_v7  ;;  %v3834_v3 = vpop.f32.mrb[63].mxu0  ;;  %v3840_v63 = vpop.f32.mrb[63].mxu1 }
 0x65b   : > { %v3417_v18 = vadd.f32 %v3978_v35, %v3409_v61  ;;  %v3418_v14 = vadd.f32 %v3979_v39, %v3410_v54 }
 0x65d   : > { %3425 = vst.msk [vmem:[%s5029_s10 + $0x20] sm:$0xff] %vm260_vm0, %v3417_v18  ;;  %3426 = vst.msk [vmem:[%s5029_s10 + $0x28] sm:$0xff] %vm260_vm0, %v3418_v14 }
 0x65e   : > { %v3341_v37 = vpop.f32.mrb[64].mxu0  ;;  %v3389_v48 = vpop.f32.mrb[64].mxu1 }
 0x65f   : > { %v3402_v0 = vadd.f32 %v3341_v37, %v3009_v4  ;;  %v3403_v21 = vadd.f32 %v3389_v48, %v3010_v30  ;;  %v3845_v1 = vpop.f32.mrb[65].mxu0  ;;  %v3851_v62 = vpop.f32.mrb[65].mxu1 }
 0x660   : > { %v3344_v46 = vpop.f32.mrb[66].mxu0  ;;  %v3392_v8 = vpop.f32.mrb[66].mxu1 }
 0x661   : > { %v3411_v11 = vmul.f32 %v5013_v58, %v3402_v0  ;;  %v3412_v13 = vmul.f32 %v5013_v58, %v3403_v21  ;;  %v3846_v6 = vpop.f32.mrb[67].mxu0  ;;  %v3852_v33 = vpop.f32.mrb[67].mxu1 }
 0x663   : > { %v3419_v59 = vadd.f32 %v3980_v28, %v3411_v11  ;;  %v3420_v60 = vadd.f32 %v3981_v40, %v3412_v13 }
 0x665   : > { %3427 = vst.msk [vmem:[%s5029_s10 + $0x30] sm:$0xff] %vm260_vm0, %v3419_v59  ;;  %3428 = vst.msk [vmem:[%s5029_s10 + $0x38] sm:$0xff] %vm260_vm0, %v3420_v60 }
 0x666   : > { %4053 = shalt.err (!%p4050_p7)
}
 0x667   : > { %s4054_s13 = scalar_lea.hbm %s5058_s7, 1024  ;;  %s4058_s24 = scalar_lea.hbm %s5114_s4, 2048 }
 0x668   : > { %p4055_p9 = scmp.ne.s32.totalorder %s5058_s7, %s4054_s13  ;;  %p4059_p5 = scmp.lt.u32.totalorder %s5058_s7, %s5114_s4 }
 0x669   : > { %p4060_p11 = scmp.lt.u32.totalorder %s4058_s24, %s4054_s13  ;;  %p4062_p4 = scmp.lt.u32.totalorder %s4054_s13, %s5058_s7 }
 0x66a   : > { %p4056_p2 = pnand %p4055_p9, %p4247_p12 }
 0x66b   : > { %p4061_p1 = por %p4060_p11, %p4059_p5 }
 0x66c   : > { %p4057_p0 = pneg %p4056_p2 }
 0x66d   : > { %p4063_p6 = por %p4062_p4, %p4061_p1 }
 0x66f   : > { %p4064_p8 = pnand %p4063_p6, %p4057_p0 }
 0x671   : > { %4067 = shalt.err (!%p4064_p8)
}
 0x672   : > { %s4126_s30 = smov 128   ;;  %s4127_s10 = smov 8  }
 0x673   : > { %3859 = dma.vmem_to_hbm [thread:$0]  (%p4247_p12), %s5060_s16, 1024, %s5058_s7, %s3430_s3, %s4126_s30, %s4126_s30, %s4127_s10  }
 0x674 PF: > { %s3458_s15 = sand.u32 1, %s4098_s17   ;;  %p5144_p10 = scmp.ne.s32.totalorder %s5125_s23, 0 }
 0x675   : > { %p5145_p13 = scmp.ge.s32.totalorder %s4110_s20, 2  ;;  %s3459_s5 = scalar_lea.sflag [#allocation5], %s3458_s15 }
 0x677   : > { %p3870_p3 = pnand %p5145_p13, %p5144_p10 }
 0x679   : > { %4093 = dma.done.wait (!%p3870_p3), %s3459_s5, 1024  }
 0x67a   : > { %4095 = vsyncadd (!%p3870_p3), %s3459_s5, 4294966272  ;;  %p19_p7 = scmp.ge.s32.totalorder %s4212_s28, 4   ;;  %s5146_s17 = smov %s4102_s18 }
 0x67b   : > { %s5147_s18 = smov %s4106_s19  ;;  %s5148_s19 = smov %s4243_s21 }
 0x67c   : > { %s5149_s20 = smov %s4212_s28  ;;  %21 = sbr.rel (!%p19_p7) target bundleno = 8 (0x8), region = 85 }
 0x683   :  { %3464 = vsyncpa [#allocation4], 1 }
 0x684   :  { %3466 = vsyncpa [#allocation4 + $0x1], 1 }
 0x685   :  { %3467 = vsyncpa [#allocation7], 1 }
 0x686   :  { %3468 = vsyncpa [#allocation5], 1 }
 0x687   :  { %3470 = vsyncpa [#allocation5 + $0x1], 1 }

</bundles_post_ra>
